<compile_context>
chip_gen: v5e
topology: v5e:2x2
jax: 0.10.0
libtpu: 0.0.40
codegen_flags: <defaults>
</compile_context>

<pallas_src>
import jax
import jax.numpy as jnp
from jax import lax
from jax.experimental import pallas as pl
from jax.experimental.pallas import tpu as pltpu


_VMEM = pl.BlockSpec(memory_space=pltpu.MemorySpace.VMEM)

_LANE = 128
_MAX_TILE_M = 1024   # pooled-output columns per grid step (4*TILE_M MXU lanes)


def _round_up(x, m):
    return ((x + m - 1) // m) * m


# ----------------------------- Pallas kernels ------------------------------

def _conv_pool_kernel(cols_ref, w_ref, b_ref, o_ref):
    """Fused im2col-GEMM conv + bias + ReLU + 2x2/2 maxpool (one grid step).

    cols_ref : (K, 4*T) bf16  columns for T pooled positions x 4 pool corners,
                              laid out [corner0 | corner1 | corner2 | corner3]
    w_ref    : (Cout, K) bf16
    b_ref    : (Cout, 1) f32
    o_ref    : (Cout, T) bf16 pooled/activated output tile (lane-dense)
    """
    t = cols_ref.shape[1] // 4
    # One long MXU stream instead of 4 short ones; f32 accumulation.
    acc = jnp.dot(w_ref[...], cols_ref[...], preferred_element_type=jnp.float32)
    # t is a multiple of 128 -> lane-aligned static slices, then tree max.
    m = jnp.maximum(jnp.maximum(acc[:, 0:t], acc[:, t:2 * t]),
                    jnp.maximum(acc[:, 2 * t:3 * t], acc[:, 3 * t:4 * t]))
    # max_i(conv_i) + b == max_i(conv_i + b) and relu(max) == max(relu),
    # so this equals pool(relu(conv(x) + b)).
    o_ref[...] = jnp.maximum(m + b_ref[...], 0.0).astype(o_ref.dtype)


def _fc_stack_kernel(x_ref, w1_ref, b1_ref, w2_ref, b2_ref, w3_ref, b3_ref,
                     o_ref):
    """Fused fc1->ReLU->fc2->ReLU->fc3. bf16 MXU operands, f32 accumulation;
    128-padded intermediates (lane-dense) never leave VMEM."""
    h = jnp.dot(x_ref[...], w1_ref[...], preferred_element_type=jnp.float32)
    h = jnp.maximum(h + b1_ref[...], 0.0).astype(jnp.bfloat16)
    h = jnp.dot(h, w2_ref[...], preferred_element_type=jnp.float32)
    h = jnp.maximum(h + b2_ref[...], 0.0).astype(jnp.bfloat16)
    h = jnp.dot(h, w3_ref[...], preferred_element_type=jnp.float32)
    o_ref[...] = (h + b3_ref[...]).astype(o_ref.dtype)


# ------------------------------- Glue (JAX) --------------------------------

def _build_pooled_cols(x_cbhw, k, k_pad, tile_m):
    """im2col columns grouped [tile, pool-corner, within-tile] along the lane
    axis, zero-padded to (k_pad, n_tiles*4*tile_m), in bf16.

    x_cbhw: (Cin, B, H, W).  K index = ci*k*k + di*k + dj (torch weight
    order), M index = b*Hp*Wp + oh*Wp + ow with Hp = (H-k+1)//2.
    """
    C, B, H, W = x_cbhw.shape
    Hp, Wp = (H - k + 1) // 2, (W - k + 1) // 2
    Mp = B * Hp * Wp
    K = C * k * k
    n_tiles = pl.cdiv(Mp, tile_m)
    m_pad = n_tiles * tile_m
    corners = []
    for pi in range(2):
        for pj in range(2):
            patches = []
            for di in range(k):
                for dj in range(k):
                    h0, w0 = pi + di, pj + dj
                    patches.append(
                        x_cbhw[:, :, h0:h0 + 2 * Hp:2, w0:w0 + 2 * Wp:2])
            p = jnp.stack(patches, axis=1).reshape(K, Mp)   # (C*k*k, Mp)
            p = jnp.pad(p, ((0, k_pad - K), (0, m_pad - Mp)))
            corners.append(p.reshape(k_pad, n_tiles, tile_m))
    cols = jnp.stack(corners, axis=2)                       # (k_pad, nt, 4, T)
    return cols.reshape(k_pad, n_tiles * 4 * tile_m), n_tiles, m_pad


def conv_relu_pool(x_cbhw, w_mat, b_col, k):
    """x_cbhw: (Cin,B,H,W) bf16; w_mat: (Cout,K_pad) bf16; b_col: (Cout,1) f32.
    Returns the pooled activation as (Cout, B, Hp, Wp) in bf16."""
    Cout, K_pad = w_mat.shape
    _, B, H, W = x_cbhw.shape
    Hp, Wp = (H - k + 1) // 2, (W - k + 1) // 2
    Mp = B * Hp * Wp
    tile_m = min(_MAX_TILE_M, _round_up(Mp, _LANE))
    # TODO(synk): build the im2col columns inside the kernel (in-VMEM strided
    # gather from x) instead of materializing the ~13-19x expanded tensor via
    # XLA; bf16 columns halve the traffic but do not remove the expansion.
    cols, n_tiles, m_pad = _build_pooled_cols(x_cbhw, k, K_pad, tile_m)

    flops = 2 * Cout * K_pad * 4 * m_pad
    bytes_accessed = (cols.size * 2 + w_mat.size * 2 + b_col.size * 4
                      + Cout * m_pad * 2)
    # Per-step VMEM (double-buffered cols tile + weights + out tile) is <2 MB,
    # well under the default scoped-VMEM limit on v5e/v6e/v7x, so no explicit
    # vmem_limit_bytes override is needed once the grid is in place.
    out = pl.pallas_call(
        _conv_pool_kernel,
        out_shape=jax.ShapeDtypeStruct((Cout, m_pad), jnp.bfloat16),
        grid=(n_tiles,),
        in_specs=[
            pl.BlockSpec((K_pad, 4 * tile_m), lambda i: (0, i)),
            pl.BlockSpec((Cout, K_pad), lambda i: (0, 0)),
            pl.BlockSpec((Cout, 1), lambda i: (0, 0)),
        ],
        out_specs=pl.BlockSpec((Cout, tile_m), lambda i: (0, i)),
        compiler_params=pltpu.CompilerParams(
            dimension_semantics=("parallel",)),   # shard Mp across v7x's 2 TCs
        cost_estimate=pl.CostEstimate(flops=flops, transcendentals=0,
                                      bytes_accessed=bytes_accessed),
    )(cols, w_mat, b_col)
    return out[:, :Mp].reshape(Cout, B, Hp, Wp)


def fc_stack(x, p):
    """x: (B, 400) bf16 -> logits (B, 10) f32."""
    B = x.shape[0]
    w1, b1, w2, b2, w3, b3 = (p["fc1_w"], p["fc1_b"], p["fc2_w"], p["fc2_b"],
                              p["fc3_w"], p["fc3_b"])
    flops = 2 * B * (w1.shape[0] * w1.shape[1] + w2.shape[0] * w2.shape[1]
                     + w3.shape[0] * w3.shape[1])
    bytes_accessed = 2 * (x.size + w1.size + w2.size + w3.size) + 4 * (
        b1.size + b2.size + b3.size + B * w3.shape[1])
    # TODO(synk): for B >= 128, grid over B ("parallel") and/or compute the
    # stack transposed ((out, B) with weights (out, in)) so B sits on lanes.
    return pl.pallas_call(
        _fc_stack_kernel,
        out_shape=jax.ShapeDtypeStruct((B, w3.shape[1]), jnp.float32),
        in_specs=[_VMEM] * 7,
        out_specs=_VMEM,
        cost_estimate=pl.CostEstimate(flops=flops, transcendentals=0,
                                      bytes_accessed=bytes_accessed),
    )(x, w1, b1, w2, b2, w3, b3)


# --------------------------------- Params -----------------------------------

def init_torch_params(key):
    """f32 parameters in the PyTorch layouts (Conv2d: (Cout,Cin,k,k);
    Linear: (out,in))."""
    ks = jax.random.split(key, 10)
    s = 0.05
    return {
        "conv1_w": s * jax.random.normal(ks[0], (6, 3, 5, 5), jnp.float32),
        "conv1_b": s * jax.random.normal(ks[1], (6,), jnp.float32),
        "conv2_w": s * jax.random.normal(ks[2], (16, 6, 5, 5), jnp.float32),
        "conv2_b": s * jax.random.normal(ks[3], (16,), jnp.float32),
        "fc1_w": s * jax.random.normal(ks[4], (120, 400), jnp.float32),
        "fc1_b": s * jax.random.normal(ks[5], (120,), jnp.float32),
        "fc2_w": s * jax.random.normal(ks[6], (84, 120), jnp.float32),
        "fc2_b": s * jax.random.normal(ks[7], (84,), jnp.float32),
        "fc3_w": s * jax.random.normal(ks[8], (10, 84), jnp.float32),
        "fc3_b": s * jax.random.normal(ks[9], (10,), jnp.float32),
    }


def prepare_params(tp):
    """One-time conversion to kernel-ready layouts: conv weights -> bf16
    (Cout, K_pad) with K zero-padded to a 16-multiple; FC weights -> bf16
    (in_pad, out_pad) pre-transposed with 120/84 zero-padded to 128 (zero
    padding keeps the math exact)."""
    def conv(w, b, k_pad):
        cout = w.shape[0]
        k = w.shape[1] * w.shape[2] * w.shape[3]
        wm = jnp.pad(w.reshape(cout, k), ((0, 0), (0, k_pad - k)))
        return wm.astype(jnp.bfloat16), b.reshape(cout, 1).astype(jnp.float32)

    def fc(w, b, in_pad, out_pad):
        wt = w.T                                       # (in, out): no runtime .T
        wt = jnp.pad(wt, ((0, in_pad - wt.shape[0]),
                          (0, out_pad - wt.shape[1])))
        bp = jnp.pad(b, (0, out_pad - b.shape[0])).reshape(1, -1)
        return wt.astype(jnp.bfloat16), bp.astype(jnp.float32)

    p = {}
    p["conv1_w"], p["conv1_b"] = conv(tp["conv1_w"], tp["conv1_b"], 80)
    p["conv2_w"], p["conv2_b"] = conv(tp["conv2_w"], tp["conv2_b"], 160)
    p["fc1_w"], p["fc1_b"] = fc(tp["fc1_w"], tp["fc1_b"], 400, 128)
    p["fc2_w"], p["fc2_b"] = fc(tp["fc2_w"], tp["fc2_b"], 128, 128)
    p["fc3_w"], p["fc3_b"] = fc(tp["fc3_w"], tp["fc3_b"], 128, 10)
    return p


# -------------------------------- Forward -----------------------------------

@jax.jit
def cnn_forward(x_nchw, p):
    B = x_nchw.shape[0]
    # One-time layout/dtype change: NCHW f32 -> channel-major bf16 (Cin,B,H,W).
    x = x_nchw.astype(jnp.bfloat16).transpose(1, 0, 2, 3)
    x = conv_relu_pool(x, p["conv1_w"], p["conv1_b"], 5)       # (6, B, 14, 14)
    x = conv_relu_pool(x, p["conv2_w"], p["conv2_b"], 5)       # (16, B, 5, 5)
    # Flatten to (B, 400) in torch's .view(-1, 16*5*5) order (C, H, W).
    # TODO(synk): fuse conv2 + this ~1.6 KB/sample flatten + the FC stack into
    # a single pallas_call to drop one launch and the conv2 HBM round-trip.
    x = x.reshape(16, B, 25).transpose(1, 0, 2).reshape(B, 16 * 5 * 5)
    return fc_stack(x, p)                                      # (B, 10) f32


def reference_forward(x_nchw, tp):
    """Pure-XLA reference using the same bf16-rounded operands as the kernels
    (so only accumulation/layout differences remain)."""
    def r(a):
        return a.astype(jnp.bfloat16).astype(jnp.float32)

    def conv_block(x, w, b):
        y = lax.conv(x, r(w), (1, 1), "VALID") + b.reshape(1, -1, 1, 1)
        y = jnp.maximum(y, 0.0)
        y = lax.reduce_window(y, -jnp.inf, lax.max, (1, 1, 2, 2), (1, 1, 2, 2),
                              "VALID")
        return r(y)

    x = conv_block(r(x_nchw), tp["conv1_w"], tp["conv1_b"])
    x = conv_block(x, tp["conv2_w"], tp["conv2_b"])
    x = x.reshape(x.shape[0], -1)
    h = r(jnp.maximum(x @ r(tp["fc1_w"]).T + tp["fc1_b"], 0.0))
    h = r(jnp.maximum(h @ r(tp["fc2_w"]).T + tp["fc2_b"], 0.0))
    return h @ r(tp["fc3_w"]).T + tp["fc3_b"]


if __name__ == "__main__":
    key = jax.random.PRNGKey(0)
    k_x, k_p = jax.random.split(key)
    # Input must be 3x32x32 so the flatten matches 16*5*5 (as in the spec).
    x = jax.random.normal(k_x, (2, 3, 32, 32), jnp.float32)
    torch_params = init_torch_params(k_p)
    params = prepare_params(torch_params)

    out = jax.block_until_ready(cnn_forward(x, params))
    assert out.shape == (2, 10), out.shape
    assert out.dtype == jnp.float32

    ref = reference_forward(x, torch_params)
    max_err = float(jnp.max(jnp.abs(out - ref)))
    assert max_err < 5e-2, max_err
    print("KERNEL_OK")
</pallas_src>

<mosaic_0001>
module attributes {stable_mosaic.version = 11 : i64} {
  func.func @_conv_pool_kernel(%arg0: i32, %arg1: memref<80x2048xbf16, #tpu.memory_space<vmem>>, %arg2: memref<6x80xbf16, #tpu.memory_space<vmem>>, %arg3: memref<6x1xf32, #tpu.memory_space<vmem>>, %arg4: memref<6x512xbf16, #tpu.memory_space<vmem>>) attributes {dimension_semantics = [#tpu.dimension_semantics<parallel>], iteration_bounds = array<i64: 1>, scalar_prefetch = 0 : i64, scratch_operands = 0 : i64, tpu.core_type = #tpu.core_type<tc>, window_params = [{transform_indices = @transform_0, window_bounds = array<i64: 80, 2048>}, {pipeline_mode = #tpu.pipeline_mode<synchronous>, transform_indices = @transform_1, window_bounds = array<i64: 6, 80>}, {pipeline_mode = #tpu.pipeline_mode<synchronous>, transform_indices = @transform_2, window_bounds = array<i64: 6, 1>}, {transform_indices = @transform_3, window_bounds = array<i64: 6, 512>}]} {
    %c0 = arith.constant 0 : index
    %c0_0 = arith.constant 0 : index
    %0 = vector.load %arg2[%c0, %c0_0] : memref<6x80xbf16, #tpu.memory_space<vmem>>, vector<6x80xbf16>
    %c0_1 = arith.constant 0 : index
    %c0_2 = arith.constant 0 : index
    %1 = vector.load %arg1[%c0_1, %c0_2] : memref<80x2048xbf16, #tpu.memory_space<vmem>>, vector<80x2048xbf16>
    %cst = arith.constant dense<0.000000e+00> : vector<6x2048xf32>
    %2 = tpu.matmul %0, %1, %cst {dimension_numbers = #tpu.dot_dimension_numbers<[1], [0], [0], [1], [0, 0, 1, 1], [], []>} : vector<6x80xbf16>, vector<80x2048xbf16>, vector<6x2048xf32> -> vector<6x2048xf32>
    %3 = vector.extract_strided_slice %2 {offsets = [0, 0], sizes = [6, 512], strides = [1, 1]} : vector<6x2048xf32> to vector<6x512xf32>
    %4 = vector.extract_strided_slice %2 {offsets = [0, 512], sizes = [6, 512], strides = [1, 1]} : vector<6x2048xf32> to vector<6x512xf32>
    %5 = arith.maximumf %3, %4 : vector<6x512xf32>
    %6 = vector.extract_strided_slice %2 {offsets = [0, 1024], sizes = [6, 512], strides = [1, 1]} : vector<6x2048xf32> to vector<6x512xf32>
    %7 = vector.extract_strided_slice %2 {offsets = [0, 1536], sizes = [6, 512], strides = [1, 1]} : vector<6x2048xf32> to vector<6x512xf32>
    %8 = arith.maximumf %6, %7 : vector<6x512xf32>
    %9 = arith.maximumf %5, %8 : vector<6x512xf32>
    %c0_3 = arith.constant 0 : index
    %c0_4 = arith.constant 0 : index
    %10 = vector.load %arg3[%c0_3, %c0_4] : memref<6x1xf32, #tpu.memory_space<vmem>>, vector<6x1xf32>
    %11 = vector.broadcast %10 : vector<6x1xf32> to vector<6x512xf32>
    %12 = arith.addf %9, %11 : vector<6x512xf32>
    %cst_5 = arith.constant 0.000000e+00 : f32
    %13 = vector.broadcast %cst_5 : f32 to vector<6x512xf32>
    %14 = arith.maximumf %12, %13 : vector<6x512xf32>
    %15 = arith.truncf %14 : vector<6x512xf32> to vector<6x512xbf16>
    %c0_6 = arith.constant 0 : index
    %c0_7 = arith.constant 0 : index
    %16 = vector.load %arg4[%c0_6, %c0_7] : memref<6x512xbf16, #tpu.memory_space<vmem>>, vector<6x512xbf16>
    tpu.vector_store %arg4[%c0_6, %c0_7], %15 {strides = array<i32>} : memref<6x512xbf16, #tpu.memory_space<vmem>>, vector<6x512xbf16>,
    return
  }
  func.func @transform_0(%arg0: i32) -> (i32, i32) {
    %c0_i32 = arith.constant 0 : i32
    %c0_i32_0 = arith.constant 0 : i32
    return %c0_i32, %arg0 : i32, i32
  }
  func.func @transform_1(%arg0: i32) -> (i32, i32) {
    %c0_i32 = arith.constant 0 : i32
    %c0_i32_0 = arith.constant 0 : i32
    %c0_i32_1 = arith.constant 0 : i32
    return %c0_i32, %c0_i32_0 : i32, i32
  }
  func.func @transform_2(%arg0: i32) -> (i32, i32) {
    %c0_i32 = arith.constant 0 : i32
    %c0_i32_0 = arith.constant 0 : i32
    %c0_i32_1 = arith.constant 0 : i32
    return %c0_i32, %c0_i32_0 : i32, i32
  }
  func.func @transform_3(%arg0: i32) -> (i32, i32) {
    %c0_i32 = arith.constant 0 : i32
    %c0_i32_0 = arith.constant 0 : i32
    return %c0_i32, %arg0 : i32, i32
  }
}

module attributes {stable_mosaic.version = 11 : i64} {
  func.func @_conv_pool_kernel(%arg0: i32, %arg1: memref<160x512xbf16, #tpu.memory_space<vmem>>, %arg2: memref<16x160xbf16, #tpu.memory_space<vmem>>, %arg3: memref<16x1xf32, #tpu.memory_space<vmem>>, %arg4: memref<16x128xbf16, #tpu.memory_space<vmem>>) attributes {dimension_semantics = [#tpu.dimension_semantics<parallel>], iteration_bounds = array<i64: 1>, scalar_prefetch = 0 : i64, scratch_operands = 0 : i64, tpu.core_type = #tpu.core_type<tc>, window_params = [{transform_indices = @transform_0, window_bounds = array<i64: 160, 512>}, {pipeline_mode = #tpu.pipeline_mode<synchronous>, transform_indices = @transform_1, window_bounds = array<i64: 16, 160>}, {pipeline_mode = #tpu.pipeline_mode<synchronous>, transform_indices = @transform_2, window_bounds = array<i64: 16, 1>}, {transform_indices = @transform_3, window_bounds = array<i64: 16, 128>}]} {
    %c0 = arith.constant 0 : index
    %c0_0 = arith.constant 0 : index
    %0 = vector.load %arg2[%c0, %c0_0] : memref<16x160xbf16, #tpu.memory_space<vmem>>, vector<16x160xbf16>
    %c0_1 = arith.constant 0 : index
    %c0_2 = arith.constant 0 : index
    %1 = vector.load %arg1[%c0_1, %c0_2] : memref<160x512xbf16, #tpu.memory_space<vmem>>, vector<160x512xbf16>
    %cst = arith.constant dense<0.000000e+00> : vector<16x512xf32>
    %2 = tpu.matmul %0, %1, %cst {dimension_numbers = #tpu.dot_dimension_numbers<[1], [0], [0], [1], [0, 0, 1, 1], [], []>} : vector<16x160xbf16>, vector<160x512xbf16>, vector<16x512xf32> -> vector<16x512xf32>
    %3 = vector.extract_strided_slice %2 {offsets = [0, 0], sizes = [16, 128], strides = [1, 1]} : vector<16x512xf32> to vector<16x128xf32>
    %4 = vector.extract_strided_slice %2 {offsets = [0, 128], sizes = [16, 128], strides = [1, 1]} : vector<16x512xf32> to vector<16x128xf32>
    %5 = arith.maximumf %3, %4 : vector<16x128xf32>
    %6 = vector.extract_strided_slice %2 {offsets = [0, 256], sizes = [16, 128], strides = [1, 1]} : vector<16x512xf32> to vector<16x128xf32>
    %7 = vector.extract_strided_slice %2 {offsets = [0, 384], sizes = [16, 128], strides = [1, 1]} : vector<16x512xf32> to vector<16x128xf32>
    %8 = arith.maximumf %6, %7 : vector<16x128xf32>
    %9 = arith.maximumf %5, %8 : vector<16x128xf32>
    %c0_3 = arith.constant 0 : index
    %c0_4 = arith.constant 0 : index
    %10 = vector.load %arg3[%c0_3, %c0_4] : memref<16x1xf32, #tpu.memory_space<vmem>>, vector<16x1xf32>
    %11 = vector.broadcast %10 : vector<16x1xf32> to vector<16x128xf32>
    %12 = arith.addf %9, %11 : vector<16x128xf32>
    %cst_5 = arith.constant 0.000000e+00 : f32
    %13 = vector.broadcast %cst_5 : f32 to vector<16x128xf32>
    %14 = arith.maximumf %12, %13 : vector<16x128xf32>
    %15 = arith.truncf %14 : vector<16x128xf32> to vector<16x128xbf16>
    %c0_6 = arith.constant 0 : index
    %c0_7 = arith.constant 0 : index
    %16 = vector.load %arg4[%c0_6, %c0_7] : memref<16x128xbf16, #tpu.memory_space<vmem>>, vector<16x128xbf16>
    tpu.vector_store %arg4[%c0_6, %c0_7], %15 {strides = array<i32>} : memref<16x128xbf16, #tpu.memory_space<vmem>>, vector<16x128xbf16>,
    return
  }
  func.func @transform_0(%arg0: i32) -> (i32, i32) {
    %c0_i32 = arith.constant 0 : i32
    %c0_i32_0 = arith.constant 0 : i32
    return %c0_i32, %arg0 : i32, i32
  }
  func.func @transform_1(%arg0: i32) -> (i32, i32) {
    %c0_i32 = arith.constant 0 : i32
    %c0_i32_0 = arith.constant 0 : i32
    %c0_i32_1 = arith.constant 0 : i32
    return %c0_i32, %c0_i32_0 : i32, i32
  }
  func.func @transform_2(%arg0: i32) -> (i32, i32) {
    %c0_i32 = arith.constant 0 : i32
    %c0_i32_0 = arith.constant 0 : i32
    %c0_i32_1 = arith.constant 0 : i32
    return %c0_i32, %c0_i32_0 : i32, i32
  }
  func.func @transform_3(%arg0: i32) -> (i32, i32) {
    %c0_i32 = arith.constant 0 : i32
    %c0_i32_0 = arith.constant 0 : i32
    return %c0_i32, %arg0 : i32, i32
  }
}

module attributes {stable_mosaic.version = 11 : i64} {
  func.func @_fc_stack_kernel(%arg0: memref<2x400xbf16, #tpu.memory_space<vmem>>, %arg1: memref<400x128xbf16, #tpu.memory_space<vmem>>, %arg2: memref<1x128xf32, #tpu.memory_space<vmem>>, %arg3: memref<128x128xbf16, #tpu.memory_space<vmem>>, %arg4: memref<1x128xf32, #tpu.memory_space<vmem>>, %arg5: memref<128x10xbf16, #tpu.memory_space<vmem>>, %arg6: memref<1x10xf32, #tpu.memory_space<vmem>>, %arg7: memref<2x10xf32, #tpu.memory_space<vmem>>) attributes {dimension_semantics = [], scalar_prefetch = 0 : i64, scratch_operands = 0 : i64, tpu.core_type = #tpu.core_type<tc>} {
    %c0 = arith.constant 0 : index
    %c0_0 = arith.constant 0 : index
    %0 = vector.load %arg0[%c0, %c0_0] : memref<2x400xbf16, #tpu.memory_space<vmem>>, vector<2x400xbf16>
    %c0_1 = arith.constant 0 : index
    %c0_2 = arith.constant 0 : index
    %1 = vector.load %arg1[%c0_1, %c0_2] : memref<400x128xbf16, #tpu.memory_space<vmem>>, vector<400x128xbf16>
    %cst = arith.constant dense<0.000000e+00> : vector<2x128xf32>
    %2 = tpu.matmul %0, %1, %cst {dimension_numbers = #tpu.dot_dimension_numbers<[1], [0], [0], [1], [0, 0, 1, 1], [], []>} : vector<2x400xbf16>, vector<400x128xbf16>, vector<2x128xf32> -> vector<2x128xf32>
    %c0_3 = arith.constant 0 : index
    %c0_4 = arith.constant 0 : index
    %3 = vector.load %arg2[%c0_3, %c0_4] : memref<1x128xf32, #tpu.memory_space<vmem>>, vector<1x128xf32>
    %4 = vector.broadcast %3 : vector<1x128xf32> to vector<2x128xf32>
    %5 = arith.addf %2, %4 : vector<2x128xf32>
    %cst_5 = arith.constant 0.000000e+00 : f32
    %6 = vector.broadcast %cst_5 : f32 to vector<2x128xf32>
    %7 = arith.maximumf %5, %6 : vector<2x128xf32>
    %8 = arith.truncf %7 : vector<2x128xf32> to vector<2x128xbf16>
    %c0_6 = arith.constant 0 : index
    %c0_7 = arith.constant 0 : index
    %9 = vector.load %arg3[%c0_6, %c0_7] : memref<128x128xbf16, #tpu.memory_space<vmem>>, vector<128x128xbf16>
    %cst_8 = arith.constant dense<0.000000e+00> : vector<2x128xf32>
    %10 = tpu.matmul %8, %9, %cst_8 {dimension_numbers = #tpu.dot_dimension_numbers<[1], [0], [0], [1], [0, 0, 1, 1], [], []>} : vector<2x128xbf16>, vector<128x128xbf16>, vector<2x128xf32> -> vector<2x128xf32>
    %c0_9 = arith.constant 0 : index
    %c0_10 = arith.constant 0 : index
    %11 = vector.load %arg4[%c0_9, %c0_10] : memref<1x128xf32, #tpu.memory_space<vmem>>, vector<1x128xf32>
    %12 = vector.broadcast %11 : vector<1x128xf32> to vector<2x128xf32>
    %13 = arith.addf %10, %12 : vector<2x128xf32>
    %cst_11 = arith.constant 0.000000e+00 : f32
    %14 = vector.broadcast %cst_11 : f32 to vector<2x128xf32>
    %15 = arith.maximumf %13, %14 : vector<2x128xf32>
    %16 = arith.truncf %15 : vector<2x128xf32> to vector<2x128xbf16>
    %c0_12 = arith.constant 0 : index
    %c0_13 = arith.constant 0 : index
    %17 = vector.load %arg5[%c0_12, %c0_13] : memref<128x10xbf16, #tpu.memory_space<vmem>>, vector<128x10xbf16>
    %cst_14 = arith.constant dense<0.000000e+00> : vector<2x10xf32>
    %18 = tpu.matmul %16, %17, %cst_14 {dimension_numbers = #tpu.dot_dimension_numbers<[1], [0], [0], [1], [0, 0, 1, 1], [], []>} : vector<2x128xbf16>, vector<128x10xbf16>, vector<2x10xf32> -> vector<2x10xf32>
    %c0_15 = arith.constant 0 : index
    %c0_16 = arith.constant 0 : index
    %19 = vector.load %arg6[%c0_15, %c0_16] : memref<1x10xf32, #tpu.memory_space<vmem>>, vector<1x10xf32>
    %20 = vector.broadcast %19 : vector<1x10xf32> to vector<2x10xf32>
    %21 = arith.addf %18, %20 : vector<2x10xf32>
    %c0_17 = arith.constant 0 : index
    %c0_18 = arith.constant 0 : index
    %22 = vector.load %arg7[%c0_17, %c0_18] : memref<2x10xf32, #tpu.memory_space<vmem>>, vector<2x10xf32>
    tpu.vector_store %arg7[%c0_17, %c0_18], %21 {strides = array<i32>} : memref<2x10xf32, #tpu.memory_space<vmem>>, vector<2x10xf32>,
    return
  }
}

</mosaic_0001>

<bundles_post_ra>
// kernel: cnn_forward.3
= control target key start
LH: loop header
LB: loop body
LE: loop exit
PB: predicated region body
PF: predicated region fallthrough
CT: control target
= control target key end

     0   :  { %vm496_vm0 = vcmask 654336   ;;  %s1707_s0 = inlined_call_operand.vmem [shape: bf16[80,2048], index: 0, kind: input, shape index: {}]   ;;  %s1708_s1 = inlined_call_operand.vmem [shape: bf16[6,80], index: 1, kind: input, shape index: {}]   ;;  %s1709_s2 = inlined_call_operand.vmem [shape: f32[6,1], index: 2, kind: input, shape index: {}]   ;;  %s1710_s3 = inlined_call_operand.vmem [shape: bf16[6,512], index: 3, kind: output, shape index: {}]  }
   0x1   :  { %v1000_v0 = vld [vmem:[%s1707_s0 + $0x200] sm:$0xf]  ;;  %v1142_v2 = vld [vmem:[%s1707_s0 + $0x204] sm:$0xf]  ;;  %v1008_v5 = vld [vmem:[%s1707_s0 + $0x208] sm:$0xf] }
   0x2   :  { %v1150_v1 = vld [vmem:[%s1707_s0 + $0x23c] sm:$0xf0]  ;;  %v1002_v4 = vld [vmem:[%s1707_s0 + $0x240] sm:$0xf0]  ;;  %v1151_v6 = vld [vmem:[%s1707_s0 + $0x244] sm:$0xf0] }
   0x3   :  { %v1001_v3 = vor.u32 %v1150_v1, %v1000_v0  ;;  %v1005_v7 = vor.u32 %v1142_v2, %v1002_v4  ;;  %v1009_v8 = vor.u32 %v1151_v6, %v1008_v5  ;;  %v1143_v9 = vld [vmem:[%s1707_s0 + $0x20c] sm:$0xf]  ;;  %v936_v11 = vld [vmem:[%s1707_s0 + $0x180] sm:$0xf]  ;;  %v1126_v14 = vld [vmem:[%s1707_s0 + $0x184] sm:$0xf] }
   0x4   :  { %v1010_v10 = vld [vmem:[%s1707_s0 + $0x248] sm:$0xf0]  ;;  %v1134_v13 = vld [vmem:[%s1707_s0 + $0x1bc] sm:$0xf0]  ;;  %v938_v15 = vld [vmem:[%s1707_s0 + $0x1c0] sm:$0xf0] }
   0x5   :  { %503 = vmatpush.bf16.msra.mxu0 %v1001_v3  ;;  %v1013_v12 = vor.u32 %v1143_v9, %v1010_v10  ;;  %516 = vmatpush.bf16.msra.mxu1 %v1005_v7  ;;  %v937_v16 = vor.u32 %v1134_v13, %v936_v11  ;;  %v941_v17 = vor.u32 %v1126_v14, %v938_v15  ;;  %v944_v18 = vld [vmem:[%s1707_s0 + $0x188] sm:$0xf]  ;;  %v1127_v20 = vld [vmem:[%s1707_s0 + $0x18c] sm:$0xf]  ;;  %v872_v23 = vld [vmem:[%s1707_s0 + $0x100] sm:$0xf] }
   0x6   :  { %529 = vmatpush.bf16.msra.mxu2 %v1009_v8  ;;  %v1135_v19 = vld [vmem:[%s1707_s0 + $0x1c4] sm:$0xf0]  ;;  %v946_v22 = vld [vmem:[%s1707_s0 + $0x1c8] sm:$0xf0]  ;;  %v1118_v24 = vld [vmem:[%s1707_s0 + $0x13c] sm:$0xf0] }
   0x7   :  { %542 = vmatpush.bf16.msra.mxu3 %v1013_v12  ;;  %v945_v21 = vor.u32 %v1135_v19, %v944_v18  ;;  %v949_v25 = vor.u32 %v1127_v20, %v946_v22  ;;  %v1110_v26 = vld [vmem:[%s1707_s0 + $0x104] sm:$0xf]  ;;  %v880_v28 = vld [vmem:[%s1707_s0 + $0x108] sm:$0xf]  ;;  %v873_v29 = vor.u32 %v1118_v24, %v872_v23  ;;  %v1111_v31 = vld [vmem:[%s1707_s0 + $0x10c] sm:$0xf] }
   0x8   :  { %v874_v27 = vld [vmem:[%s1707_s0 + $0x140] sm:$0xf0]  ;;  %v1119_v30 = vld [vmem:[%s1707_s0 + $0x144] sm:$0xf0]  ;;  %v882_v32 = vld [vmem:[%s1707_s0 + $0x148] sm:$0xf0] }
   0x9   :  { %504 = vmatpush.bf16.msra.mxu0 %v937_v16  ;;  %517 = vmatpush.bf16.msra.mxu1 %v941_v17  ;;  %v877_v33 = vor.u32 %v1110_v26, %v874_v27  ;;  %v881_v34 = vor.u32 %v1119_v30, %v880_v28  ;;  %v808_v35 = vld [vmem:[%s1707_s0 + $0x80] sm:$0xf]  ;;  %v1094_v37 = vld [vmem:[%s1707_s0 + $0x84] sm:$0xf]  ;;  %v885_v38 = vor.u32 %v1111_v31, %v882_v32  ;;  %v816_v40 = vld [vmem:[%s1707_s0 + $0x88] sm:$0xf] }
   0xa   :  { %530 = vmatpush.bf16.msra.mxu2 %v945_v21  ;;  %v1102_v36 = vld [vmem:[%s1707_s0 + $0xbc] sm:$0xf0]  ;;  %v810_v39 = vld [vmem:[%s1707_s0 + $0xc0] sm:$0xf0]  ;;  %v1103_v41 = vld [vmem:[%s1707_s0 + $0xc4] sm:$0xf0] }
   0xb   :  { %543 = vmatpush.bf16.msra.mxu3 %v949_v25  ;;  %v1095_v42 = vld [vmem:[%s1707_s0 + $0x8c] sm:$0xf]  ;;  %v809_v44 = vor.u32 %v1102_v36, %v808_v35  ;;  %v744_v45 = vld [vmem:[%s1707_s0] sm:$0xf]  ;;  %v813_v47 = vor.u32 %v1094_v37, %v810_v39  ;;  %v817_v48 = vor.u32 %v1103_v41, %v816_v40  ;;  %v1078_v49 = vld [vmem:[%s1707_s0 + $0x4] sm:$0xf] }
   0xc   :  { %v818_v43 = vld [vmem:[%s1707_s0 + $0xc8] sm:$0xf0]  ;;  %v1086_v46 = vld [vmem:[%s1707_s0 + $0x3c] sm:$0xf0]  ;;  %v746_v50 = vld [vmem:[%s1707_s0 + $0x40] sm:$0xf0] }
   0xd   :  { %505 = vmatpush.bf16.msra.mxu0 %v873_v29  ;;  %518 = vmatpush.bf16.msra.mxu1 %v877_v33  ;;  %v752_v51 = vld [vmem:[%s1707_s0 + $0x8] sm:$0xf]  ;;  %v821_v52 = vor.u32 %v1095_v42, %v818_v43  ;;  %v1079_v54 = vld [vmem:[%s1707_s0 + $0xc] sm:$0xf]  ;;  %v1016_v56 = vld [vmem:[%s1707_s0 + $0x210] sm:$0xf]  ;;  %v745_v59 = vor.u32 %v1086_v46, %v744_v45  ;;  %v749_v63 = vor.u32 %v1078_v49, %v746_v50 }
   0xe   :  { %531 = vmatpush.bf16.msra.mxu2 %v881_v34  ;;  %v1087_v53 = vld [vmem:[%s1707_s0 + $0x44] sm:$0xf0]  ;;  %v754_v55 = vld [vmem:[%s1707_s0 + $0x48] sm:$0xf0]  ;;  %v1152_v57 = vld [vmem:[%s1707_s0 + $0x24c] sm:$0xf0] }
   0xf   :  { %544 = vmatpush.bf16.msra.mxu3 %v885_v38  ;;  %v1144_v58 = vld [vmem:[%s1707_s0 + $0x214] sm:$0xf]  ;;  %v1024_v61 = vld [vmem:[%s1707_s0 + $0x218] sm:$0xf]  ;;  %v753_v0 = vor.u32 %v1087_v53, %v752_v51  ;;  %v1145_v1 = vld [vmem:[%s1707_s0 + $0x21c] sm:$0xf]  ;;  %v757_v3 = vor.u32 %v1079_v54, %v754_v55  ;;  %v1017_v4 = vor.u32 %v1152_v57, %v1016_v56 }
  0x10   :  { %v1018_v60 = vld [vmem:[%s1707_s0 + $0x250] sm:$0xf0]  ;;  %v1153_v62 = vld [vmem:[%s1707_s0 + $0x254] sm:$0xf0]  ;;  %v1026_v2 = vld [vmem:[%s1707_s0 + $0x258] sm:$0xf0] }
  0x11   :  { %506 = vmatpush.bf16.msra.mxu0 %v809_v44  ;;  %519 = vmatpush.bf16.msra.mxu1 %v813_v47  ;;  %v1021_v5 = vor.u32 %v1144_v58, %v1018_v60  ;;  %v1025_v6 = vor.u32 %v1153_v62, %v1024_v61  ;;  %v952_v7 = vld [vmem:[%s1707_s0 + $0x190] sm:$0xf]  ;;  %v1128_v9 = vld [vmem:[%s1707_s0 + $0x194] sm:$0xf]  ;;  %v1029_v10 = vor.u32 %v1145_v1, %v1026_v2  ;;  %v960_v12 = vld [vmem:[%s1707_s0 + $0x198] sm:$0xf] }
  0x12   :  { %532 = vmatpush.bf16.msra.mxu2 %v817_v48  ;;  %v1136_v8 = vld [vmem:[%s1707_s0 + $0x1cc] sm:$0xf0]  ;;  %v954_v11 = vld [vmem:[%s1707_s0 + $0x1d0] sm:$0xf0]  ;;  %v1137_v13 = vld [vmem:[%s1707_s0 + $0x1d4] sm:$0xf0] }
  0x13   :  { %545 = vmatpush.bf16.msra.mxu3 %v821_v52  ;;  %v1346_v14 = vld [vmem:[%s1708_s1] sm:$0x7]  ;;  %v1129_v15 = vld [vmem:[%s1707_s0 + $0x19c] sm:$0xf]  ;;  %v953_v17 = vor.u32 %v1136_v8, %v952_v7  ;;  %v957_v18 = vor.u32 %v1128_v9, %v954_v11  ;;  %v961_v19 = vor.u32 %v1137_v13, %v960_v12  ;;  %v888_v20 = vld [vmem:[%s1707_s0 + $0x110] sm:$0xf] }
  0x14   :  { %v962_v16 = vld [vmem:[%s1707_s0 + $0x1d8] sm:$0xf0]  ;;  %v1120_v21 = vld [vmem:[%s1707_s0 + $0x14c] sm:$0xf0]  ;;  %v1112_v22 = vld [vmem:[%s1707_s0 + $0x114] sm:$0xf] }
  0x15   :  { %507 = vmatpush.bf16.msra.mxu0 %v745_v59  ;;  %520 = vmatpush.bf16.msra.mxu1 %v749_v63  ;;  %v965_v23 = vor.u32 %v1129_v15, %v962_v16  ;;  %v890_v24 = vld [vmem:[%s1707_s0 + $0x150] sm:$0xf0]  ;;  %v896_v25 = vld [vmem:[%s1707_s0 + $0x118] sm:$0xf]  ;;  %v1113_v27 = vld [vmem:[%s1707_s0 + $0x11c] sm:$0xf]  ;;  %v889_v29 = vor.u32 %v1120_v21, %v888_v20 }
  0x16   :  { %533 = vmatpush.bf16.msra.mxu2 %v753_v0  ;;  %v1121_v26 = vld [vmem:[%s1707_s0 + $0x154] sm:$0xf0]  ;;  %v898_v28 = vld [vmem:[%s1707_s0 + $0x158] sm:$0xf0]  ;;  %v893_v30 = vor.u32 %v1112_v22, %v890_v24  ;;  %v824_v32 = vld [vmem:[%s1707_s0 + $0x90] sm:$0xf] }
  0x17   :  { %546 = vmatpush.bf16.msra.mxu3 %v757_v3  ;;  %v897_v31 = vor.u32 %v1121_v26, %v896_v25  ;;  %v1104_v33 = vld [vmem:[%s1707_s0 + $0xcc] sm:$0xf0]  ;;  %v1096_v34 = vld [vmem:[%s1707_s0 + $0x94] sm:$0xf]  ;;  %v901_v35 = vor.u32 %v1113_v27, %v898_v28  ;;  %v832_v37 = vld [vmem:[%s1707_s0 + $0x98] sm:$0xf] }
  0x18   :  { %1062 = vmatmul.msk.bf16.vlgmr.msra.gmra.mxu0 %vm496_vm0, %v1346_v14  ;;  %1063 = vmatmul.msk.bf16.vlgmr.msra.gmra.mxu1 %vm496_vm0, %v1346_v14  ;;  %v826_v36 = vld [vmem:[%s1707_s0 + $0xd0] sm:$0xf0]  ;;  %v1105_v38 = vld [vmem:[%s1707_s0 + $0xd4] sm:$0xf0]  ;;  %v1097_v39 = vld [vmem:[%s1707_s0 + $0x9c] sm:$0xf]  ;;  %v825_v41 = vor.u32 %v1104_v33, %v824_v32 }
  0x19   :  { %555 = vmatpush.bf16.msrb.mxu0 %v1017_v4  ;;  %568 = vmatpush.bf16.msrb.mxu1 %v1021_v5  ;;  %v834_v40 = vld [vmem:[%s1707_s0 + $0xd8] sm:$0xf0]  ;;  %v760_v42 = vld [vmem:[%s1707_s0 + $0x10] sm:$0xf]  ;;  %v829_v44 = vor.u32 %v1096_v34, %v826_v36  ;;  %v833_v45 = vor.u32 %v1105_v38, %v832_v37  ;;  %v1080_v46 = vld [vmem:[%s1707_s0 + $0x14] sm:$0xf] }
  0x1a   :  { %581 = vmatpush.bf16.msrb.mxu2 %v1025_v6  ;;  %1065 = vmatmul.msk.bf16.vlgmr.msra.gmra.mxu3 %vm496_vm0, %v1346_v14  ;;  %v1088_v43 = vld [vmem:[%s1707_s0 + $0x4c] sm:$0xf0]  ;;  %v762_v47 = vld [vmem:[%s1707_s0 + $0x50] sm:$0xf0]  ;;  %v768_v48 = vld [vmem:[%s1707_s0 + $0x18] sm:$0xf]  ;;  %v837_v49 = vor.u32 %v1097_v39, %v834_v40 }
  0x1b   :  { %594 = vmatpush.bf16.msrb.mxu3 %v1029_v10  ;;  %1064 = vmatmul.msk.bf16.vlgmr.msra.gmra.mxu2 %vm496_vm0, %v1346_v14  ;;  %v1089_v50 = vld [vmem:[%s1707_s0 + $0x54] sm:$0xf0]  ;;  %v1081_v51 = vld [vmem:[%s1707_s0 + $0x1c] sm:$0xf]  ;;  %v1032_v53 = vld [vmem:[%s1707_s0 + $0x220] sm:$0xf]  ;;  %v761_v56 = vor.u32 %v1088_v43, %v760_v42  ;;  %v765_v60 = vor.u32 %v1080_v46, %v762_v47 }
  0x1c   :  { %v770_v52 = vld [vmem:[%s1707_s0 + $0x58] sm:$0xf0]  ;;  %v1154_v54 = vld [vmem:[%s1707_s0 + $0x25c] sm:$0xf0]  ;;  %v1146_v55 = vld [vmem:[%s1707_s0 + $0x224] sm:$0xf]  ;;  %v769_v61 = vor.u32 %v1089_v50, %v768_v48 }
  0x1d   :  { %556 = vmatpush.bf16.msrb.mxu0 %v953_v17  ;;  %569 = vmatpush.bf16.msrb.mxu1 %v957_v18  ;;  %v1034_v57 = vld [vmem:[%s1707_s0 + $0x260] sm:$0xf0]  ;;  %v1040_v58 = vld [vmem:[%s1707_s0 + $0x228] sm:$0xf]  ;;  %v1147_v62 = vld [vmem:[%s1707_s0 + $0x22c] sm:$0xf]  ;;  %v773_v0 = vor.u32 %v1081_v51, %v770_v52  ;;  %v1033_v1 = vor.u32 %v1154_v54, %v1032_v53 }
  0x1e   :  { %582 = vmatpush.bf16.msrb.mxu2 %v961_v19  ;;  %v1155_v59 = vld [vmem:[%s1707_s0 + $0x264] sm:$0xf0]  ;;  %v1042_v63 = vld [vmem:[%s1707_s0 + $0x268] sm:$0xf0]  ;;  %v1037_v2 = vor.u32 %v1146_v55, %v1034_v57  ;;  %v968_v4 = vld [vmem:[%s1707_s0 + $0x1a0] sm:$0xf] }
  0x1f   :  { %595 = vmatpush.bf16.msrb.mxu3 %v965_v23  ;;  %v1041_v3 = vor.u32 %v1155_v59, %v1040_v58  ;;  %v1138_v5 = vld [vmem:[%s1707_s0 + $0x1dc] sm:$0xf0]  ;;  %v1130_v6 = vld [vmem:[%s1707_s0 + $0x1a4] sm:$0xf]  ;;  %v1045_v7 = vor.u32 %v1147_v62, %v1042_v63  ;;  %v976_v9 = vld [vmem:[%s1707_s0 + $0x1a8] sm:$0xf] }
  0x20   :  { %v970_v8 = vld [vmem:[%s1707_s0 + $0x1e0] sm:$0xf0]  ;;  %v1139_v10 = vld [vmem:[%s1707_s0 + $0x1e4] sm:$0xf0]  ;;  %v1131_v11 = vld [vmem:[%s1707_s0 + $0x1ac] sm:$0xf]  ;;  %v969_v13 = vor.u32 %v1138_v5, %v968_v4 }
  0x21   :  { %557 = vmatpush.bf16.msrb.mxu0 %v889_v29  ;;  %570 = vmatpush.bf16.msrb.mxu1 %v893_v30  ;;  %v978_v12 = vld [vmem:[%s1707_s0 + $0x1e8] sm:$0xf0]  ;;  %v973_v15 = vor.u32 %v1130_v6, %v970_v8  ;;  %v977_v16 = vor.u32 %v1139_v10, %v976_v9  ;;  %v904_v17 = vld [vmem:[%s1707_s0 + $0x120] sm:$0xf]  ;;  %v1114_v19 = vld [vmem:[%s1707_s0 + $0x124] sm:$0xf] }
  0x22   :  { %583 = vmatpush.bf16.msrb.mxu2 %v897_v31  ;;  %v1122_v18 = vld [vmem:[%s1707_s0 + $0x15c] sm:$0xf0]  ;;  %v981_v20 = vor.u32 %v1131_v11, %v978_v12  ;;  %v906_v21 = vld [vmem:[%s1707_s0 + $0x160] sm:$0xf0]  ;;  %v912_v22 = vld [vmem:[%s1707_s0 + $0x128] sm:$0xf] }
  0x23   :  { %596 = vmatpush.bf16.msrb.mxu3 %v901_v35  ;;  %v1123_v23 = vld [vmem:[%s1707_s0 + $0x164] sm:$0xf0]  ;;  %v1115_v24 = vld [vmem:[%s1707_s0 + $0x12c] sm:$0xf]  ;;  %v905_v26 = vor.u32 %v1122_v18, %v904_v17  ;;  %v909_v27 = vor.u32 %v1114_v19, %v906_v21  ;;  %v840_v29 = vld [vmem:[%s1707_s0 + $0xa0] sm:$0xf] }
  0x24   :  { %v914_v25 = vld [vmem:[%s1707_s0 + $0x168] sm:$0xf0]  ;;  %v913_v28 = vor.u32 %v1123_v23, %v912_v22  ;;  %v1106_v30 = vld [vmem:[%s1707_s0 + $0xdc] sm:$0xf0]  ;;  %v1098_v31 = vld [vmem:[%s1707_s0 + $0xa4] sm:$0xf] }
  0x25   :  { %558 = vmatpush.bf16.msrb.mxu0 %v825_v41  ;;  %571 = vmatpush.bf16.msrb.mxu1 %v829_v44  ;;  %v917_v32 = vor.u32 %v1115_v24, %v914_v25  ;;  %v842_v33 = vld [vmem:[%s1707_s0 + $0xe0] sm:$0xf0]  ;;  %v848_v34 = vld [vmem:[%s1707_s0 + $0xa8] sm:$0xf]  ;;  %v1099_v36 = vld [vmem:[%s1707_s0 + $0xac] sm:$0xf]  ;;  %v841_v38 = vor.u32 %v1106_v30, %v840_v29 }
  0x26   :  { %584 = vmatpush.bf16.msrb.mxu2 %v833_v45  ;;  %v1107_v35 = vld [vmem:[%s1707_s0 + $0xe4] sm:$0xf0]  ;;  %v850_v37 = vld [vmem:[%s1707_s0 + $0xe8] sm:$0xf0]  ;;  %v776_v39 = vld [vmem:[%s1707_s0 + $0x20] sm:$0xf]  ;;  %v845_v41 = vor.u32 %v1098_v31, %v842_v33 }
  0x27   :  { %597 = vmatpush.bf16.msrb.mxu3 %v837_v49  ;;  %v1090_v40 = vld [vmem:[%s1707_s0 + $0x5c] sm:$0xf0]  ;;  %v849_v42 = vor.u32 %v1107_v35, %v848_v34  ;;  %v1082_v43 = vld [vmem:[%s1707_s0 + $0x24] sm:$0xf]  ;;  %v784_v45 = vld [vmem:[%s1707_s0 + $0x28] sm:$0xf]  ;;  %v853_v46 = vor.u32 %v1099_v36, %v850_v37 }
  0x28   :  { %v778_v44 = vld [vmem:[%s1707_s0 + $0x60] sm:$0xf0]  ;;  %v1091_v47 = vld [vmem:[%s1707_s0 + $0x64] sm:$0xf0]  ;;  %v1083_v48 = vld [vmem:[%s1707_s0 + $0x2c] sm:$0xf]  ;;  %v777_v53 = vor.u32 %v1090_v40, %v776_v39 }
  0x29   :  { %559 = vmatpush.bf16.msrb.mxu0 %v761_v56  ;;  %572 = vmatpush.bf16.msrb.mxu1 %v765_v60  ;;  %v786_v49 = vld [vmem:[%s1707_s0 + $0x68] sm:$0xf0]  ;;  %v1048_v50 = vld [vmem:[%s1707_s0 + $0x230] sm:$0xf]  ;;  %v1148_v52 = vld [vmem:[%s1707_s0 + $0x234] sm:$0xf]  ;;  %v781_v57 = vor.u32 %v1082_v43, %v778_v44  ;;  %v785_v58 = vor.u32 %v1091_v47, %v784_v45 }
  0x2a   :  { %585 = vmatpush.bf16.msrb.mxu2 %v769_v61  ;;  %v1156_v51 = vld [vmem:[%s1707_s0 + $0x26c] sm:$0xf0]  ;;  %v1050_v54 = vld [vmem:[%s1707_s0 + $0x270] sm:$0xf0]  ;;  %v1056_v55 = vld [vmem:[%s1707_s0 + $0x238] sm:$0xf]  ;;  %v789_v61 = vor.u32 %v1083_v48, %v786_v49 }
  0x2b   :  { %598 = vmatpush.bf16.msrb.mxu3 %v773_v0  ;;  %v1157_v56 = vld [vmem:[%s1707_s0 + $0x274] sm:$0xf0]  ;;  %v1149_v59 = vld [vmem:[%s1707_s0 + $0x23c] sm:$0xf]  ;;  %v1049_v62 = vor.u32 %v1156_v51, %v1048_v50  ;;  %v984_v63 = vld [vmem:[%s1707_s0 + $0x1b0] sm:$0xf]  ;;  %v1053_v0 = vor.u32 %v1148_v52, %v1050_v54 }
  0x2c   :  { %1066 = vmatmul.msk.bf16.vlgmr.msrb.gmra.mxu0 %vm496_vm0, %v1346_v14  ;;  %1067 = vmatmul.msk.bf16.vlgmr.msrb.gmra.mxu1 %vm496_vm0, %v1346_v14  ;;  %v1058_v60 = vld [vmem:[%s1707_s0 + $0x278] sm:$0xf0]  ;;  %v1160_v4 = vmov 0   ;;  %v720_v5 = vld [vmem:[%s1709_s2] sm:$0x3f] }
  0x2d   :  { %607 = vmatpush.bf16.msra.mxu0 %v1033_v1  ;;  %620 = vmatpush.bf16.msra.mxu1 %v1037_v2  ;;  %v1057_v1 = vor.u32 %v1157_v56, %v1056_v55  ;;  %v1140_v2 = vld [vmem:[%s1707_s0 + $0x1ec] sm:$0xf0]  ;;  %v1061_v6 = vor.u32 %v1149_v59, %v1058_v60  ;;  %v992_v8 = vld [vmem:[%s1707_s0 + $0x1b8] sm:$0xf]  ;;  %v1133_v10 = vld [vmem:[%s1707_s0 + $0x1bc] sm:$0xf] }
  0x2e   :  { %633 = vmatpush.bf16.msra.mxu2 %v1041_v3  ;;  %1069 = vmatmul.msk.bf16.vlgmr.msrb.gmra.mxu3 %vm496_vm0, %v1346_v14  ;;  %v1132_v3 = vld [vmem:[%s1707_s0 + $0x1b4] sm:$0xf]  ;;  %v1141_v9 = vld [vmem:[%s1707_s0 + $0x1f4] sm:$0xf0]  ;;  %v994_v11 = vld [vmem:[%s1707_s0 + $0x1f8] sm:$0xf0]  ;;  %v985_v12 = vor.u32 %v1140_v2, %v984_v63 }
  0x2f   :  { %646 = vmatpush.bf16.msra.mxu3 %v1045_v7  ;;  %1068 = vmatmul.msk.bf16.vlgmr.msrb.gmra.mxu2 %vm496_vm0, %v1346_v14  ;;  %v986_v7 = vld [vmem:[%s1707_s0 + $0x1f0] sm:$0xf0]  ;;  %v1124_v17 = vld [vmem:[%s1707_s0 + $0x16c] sm:$0xf0]  ;;  %v997_v19 = vor.u32 %v1133_v10, %v994_v11  ;;  %v928_v21 = vld [vmem:[%s1707_s0 + $0x138] sm:$0xf] }
  0x30   :  { %1159 = vset.pattern.permute.xlu0 %v1160_v4  ;;  %v1116_v18 = vld [vmem:[%s1707_s0 + $0x134] sm:$0xf]  ;;  %v1125_v22 = vld [vmem:[%s1707_s0 + $0x174] sm:$0xf0]  ;;  %v1117_v23 = vld [vmem:[%s1707_s0 + $0x13c] sm:$0xf] }
  0x31   :  { %608 = vmatpush.bf16.msra.mxu0 %v969_v13  ;;  %621 = vmatpush.bf16.msra.mxu1 %v973_v15  ;;  %v989_v13 = vor.u32 %v1132_v3, %v986_v7  ;;  %v993_v15 = vor.u32 %v1141_v9, %v992_v8  ;;  %v930_v24 = vld [vmem:[%s1707_s0 + $0x178] sm:$0xf0]  ;;  %v1108_v29 = vld [vmem:[%s1707_s0 + $0xec] sm:$0xf0]  ;;  %v1100_v30 = vld [vmem:[%s1707_s0 + $0xb4] sm:$0xf] }
  0x32   :  { %634 = vmatpush.bf16.msra.mxu2 %v977_v16  ;;  %723 = vperm.xlu0 %1159, %v720_v5   ;;  %v920_v16 = vld [vmem:[%s1707_s0 + $0x130] sm:$0xf]  ;;  %v933_v31 = vor.u32 %v1117_v23, %v930_v24  ;;  %v864_v33 = vld [vmem:[%s1707_s0 + $0xb8] sm:$0xf]  ;;  %v1101_v35 = vld [vmem:[%s1707_s0 + $0xbc] sm:$0xf] }
  0x33   :  { %647 = vmatpush.bf16.msra.mxu3 %v981_v20  ;;  %v922_v20 = vld [vmem:[%s1707_s0 + $0x170] sm:$0xf0]  ;;  %v921_v25 = vor.u32 %v1124_v17, %v920_v16  ;;  %v1109_v34 = vld [vmem:[%s1707_s0 + $0xf4] sm:$0xf0]  ;;  %v866_v36 = vld [vmem:[%s1707_s0 + $0xf8] sm:$0xf0] }
  0x34   :  { %v865_v39 = vor.u32 %v1109_v34, %v864_v33  ;;  %v792_v40 = vld [vmem:[%s1707_s0 + $0x30] sm:$0xf]  ;;  %v869_v43 = vor.u32 %v1101_v35, %v866_v36  ;;  %v794_v44 = vld [vmem:[%s1707_s0 + $0x70] sm:$0xf0]  ;;  %v800_v45 = vld [vmem:[%s1707_s0 + $0x38] sm:$0xf] }
  0x35   :  { %609 = vmatpush.bf16.msra.mxu0 %v905_v26  ;;  %622 = vmatpush.bf16.msra.mxu1 %v909_v27  ;;  %v925_v26 = vor.u32 %v1116_v18, %v922_v20  ;;  %v929_v27 = vor.u32 %v1125_v22, %v928_v21  ;;  %v1085_v47 = vld [vmem:[%s1707_s0 + $0x3c] sm:$0xf] }
  0x36   :  { %635 = vmatpush.bf16.msra.mxu2 %v913_v28  ;;  %v856_v28 = vld [vmem:[%s1707_s0 + $0xb0] sm:$0xf]  ;;  %v802_v48 = vld [vmem:[%s1707_s0 + $0x78] sm:$0xf0] }
  0x37   :  { %648 = vmatpush.bf16.msra.mxu3 %v917_v32  ;;  %v858_v32 = vld [vmem:[%s1707_s0 + $0xf0] sm:$0xf0]  ;;  %v857_v37 = vor.u32 %v1108_v29, %v856_v28  ;;  %v805_v52 = vor.u32 %v1085_v47, %v802_v48 }
  0x39   :  { %610 = vmatpush.bf16.msra.mxu0 %v841_v38  ;;  %623 = vmatpush.bf16.msra.mxu1 %v845_v41  ;;  %v861_v38 = vor.u32 %v1100_v30, %v858_v32  ;;  %v1092_v41 = vld [vmem:[%s1707_s0 + $0x6c] sm:$0xf0] }
  0x3a   :  { %636 = vmatpush.bf16.msra.mxu2 %v849_v42  ;;  %v1084_v42 = vld [vmem:[%s1707_s0 + $0x34] sm:$0xf]  ;;  %v793_v49 = vor.u32 %v1092_v41, %v792_v40 }
  0x3b   :  { %649 = vmatpush.bf16.msra.mxu3 %v853_v46  ;;  %v1093_v46 = vld [vmem:[%s1707_s0 + $0x74] sm:$0xf0]  ;;  %v797_v50 = vor.u32 %v1084_v42, %v794_v44 }
  0x3c   :  { %v801_v51 = vor.u32 %v1093_v46, %v800_v45 }
  0x3d   :  { %611 = vmatpush.bf16.msra.mxu0 %v777_v53  ;;  %624 = vmatpush.bf16.msra.mxu1 %v781_v57 }
  0x3e   :  { %637 = vmatpush.bf16.msra.mxu2 %v785_v58 }
  0x3f   :  { %650 = vmatpush.bf16.msra.mxu3 %v789_v61 }
  0x40   :  { %1070 = vmatmul.msk.bf16.vlgmr.msra.gmra.mxu0 %vm496_vm0, %v1346_v14  ;;  %1071 = vmatmul.msk.bf16.vlgmr.msra.gmra.mxu1 %vm496_vm0, %v1346_v14 }
  0x41   :  { %659 = vmatpush.bf16.msrb.mxu0 %v1049_v62  ;;  %672 = vmatpush.bf16.msrb.mxu1 %v1053_v0 }
  0x42   :  { %685 = vmatpush.bf16.msrb.mxu2 %v1057_v1  ;;  %1073 = vmatmul.msk.bf16.vlgmr.msra.gmra.mxu3 %vm496_vm0, %v1346_v14 }
  0x43   :  { %698 = vmatpush.bf16.msrb.mxu3 %v1061_v6  ;;  %1072 = vmatmul.msk.bf16.vlgmr.msra.gmra.mxu2 %vm496_vm0, %v1346_v14 }
  0x45   :  { %660 = vmatpush.bf16.msrb.mxu0 %v985_v12  ;;  %673 = vmatpush.bf16.msrb.mxu1 %v989_v13 }
  0x46   :  { %686 = vmatpush.bf16.msrb.mxu2 %v993_v15 }
  0x47   :  { %699 = vmatpush.bf16.msrb.mxu3 %v997_v19 }
  0x49   :  { %661 = vmatpush.bf16.msrb.mxu0 %v921_v25  ;;  %674 = vmatpush.bf16.msrb.mxu1 %v925_v26 }
  0x4a   :  { %687 = vmatpush.bf16.msrb.mxu2 %v929_v27 }
  0x4b   :  { %700 = vmatpush.bf16.msrb.mxu3 %v933_v31 }
  0x4d   :  { %662 = vmatpush.bf16.msrb.mxu0 %v857_v37  ;;  %675 = vmatpush.bf16.msrb.mxu1 %v861_v38 }
  0x4e   :  { %688 = vmatpush.bf16.msrb.mxu2 %v865_v39 }
  0x4f   :  { %701 = vmatpush.bf16.msrb.mxu3 %v869_v43 }
  0x51   :  { %663 = vmatpush.bf16.msrb.mxu0 %v793_v49  ;;  %676 = vmatpush.bf16.msrb.mxu1 %v797_v50 }
  0x52   :  { %689 = vmatpush.bf16.msrb.mxu2 %v801_v51 }
  0x53   :  { %702 = vmatpush.bf16.msrb.mxu3 %v805_v52 }
  0x54   :  { %1074 = vmatmul.msk.bf16.vlgmr.msrb.gmra.mxu0 %vm496_vm0, %v1346_v14  ;;  %1075 = vmatmul.msk.bf16.vlgmr.msrb.gmra.mxu1 %vm496_vm0, %v1346_v14 }
  0x55   :  { %1076 = vmatmul.msk.bf16.vlgmr.msrb.gmra.mxu2 %vm496_vm0, %v1346_v14 }
  0x56   :  { %1077 = vmatmul.msk.bf16.vlgmr.msrb.gmra.mxu3 %vm496_vm0, %v1346_v14 }
  0x95   :  { %v509_v53 = vpop.f32.mrf.mxu0  ;;  %v522_v54 = vpop.f32.mrf.mxu1 }
  0x9d   :  { %v548_v56 = vpop.f32.mrf.mxu3  ;;  %v511_v57 = vpop.f32.mrf.mxu0 }
  0x9e   :  { %v535_v55 = vpop.f32.mrf.mxu2  ;;  %v524_v58 = vpop.f32.mrf.mxu1 }
  0xa4   :  { %v724_v19 = vpop.permute.xlu0 %723 }
  0xa5   :  { %v550_v60 = vpop.f32.mrf.mxu3 }
  0xa6   :  { %v537_v59 = vpop.f32.mrf.mxu2 }
  0xa9   :  { %v561_v61 = vpop.f32.mrf.mxu0  ;;  %v574_v62 = vpop.f32.mrf.mxu1 }
  0xaa   :  { %v708_v13 = vmax.f32 %v509_v53, %v561_v61  ;;  %v709_v17 = vmax.f32 %v522_v54, %v574_v62 }
  0xb1   :  { %v600_v0 = vpop.f32.mrf.mxu3  ;;  %v563_v1 = vpop.f32.mrf.mxu0 }
  0xb2   :  { %v587_v63 = vpop.f32.mrf.mxu2  ;;  %v576_v2 = vpop.f32.mrf.mxu1  ;;  %v711_v31 = vmax.f32 %v548_v56, %v600_v0 }
  0xb3   :  { %v710_v26 = vmax.f32 %v535_v55, %v587_v63 }
  0xb9   :  { %v602_v4 = vpop.f32.mrf.mxu3 }
  0xba   :  { %v589_v3 = vpop.f32.mrf.mxu2 }
  0xbd   :  { %v613_v5 = vpop.f32.mrf.mxu0  ;;  %v626_v6 = vpop.f32.mrf.mxu1 }
  0xc5   :  { %v652_v14 = vpop.f32.mrf.mxu3  ;;  %v615_v8 = vpop.f32.mrf.mxu0 }
  0xc6   :  { %v639_v7 = vpop.f32.mrf.mxu2  ;;  %v628_v9 = vpop.f32.mrf.mxu1 }
  0xcd   :  { %v654_v11 = vpop.f32.mrf.mxu3 }
  0xce   :  { %v641_v10 = vpop.f32.mrf.mxu2 }
  0xd1   :  { %v665_v12 = vpop.f32.mrf.mxu0  ;;  %v678_v16 = vpop.f32.mrf.mxu1 }
  0xd2   :  { %v712_v15 = vmax.f32 %v613_v5, %v665_v12  ;;  %v713_v18 = vmax.f32 %v626_v6, %v678_v16 }
  0xd4   :  { %v716_v20 = vmax.f32 %v708_v13, %v712_v15  ;;  %v717_v21 = vmax.f32 %v709_v17, %v713_v18 }
  0xd6   :  { %v726_v22 = vadd.f32 %v724_v19, %v716_v20  ;;  %v727_v23 = vadd.f32 %v724_v19, %v717_v21 }
  0xd8   :  { %v730_v24 = vmax.f32 %v726_v22, 0.0  ;;  %v691_v25 = vpop.f32.mrf.mxu2  ;;  %v731_v27 = vmax.f32 %v727_v23, 0.0 }
  0xd9   :  { %v714_v28 = vmax.f32 %v639_v7, %v691_v25  ;;  %v704_v29 = vpop.f32.mrf.mxu3  ;;  %v667_v30 = vpop.f32.mrf.mxu0 }
  0xda   :  { %v715_v32 = vmax.f32 %v652_v14, %v704_v29  ;;  %v680_v33 = vpop.f32.mrf.mxu1  ;;  %v734_v34 = vpack.c.bf16 %v731_v27, %v730_v24 }
  0xdb   :  { %v718_v35 = vmax.f32 %v710_v26, %v714_v28 }
  0xdc   :  { %v719_v36 = vmax.f32 %v711_v31, %v715_v32  ;;  %736 = vst [vmem:[%s1710_s3] sm:$0x77] %v734_v34 }
  0xdd   :  { %v728_v37 = vadd.f32 %v724_v19, %v718_v35 }
  0xde   :  { %v729_v38 = vadd.f32 %v724_v19, %v719_v36 }
  0xdf   :  { %v732_v39 = vmax.f32 %v728_v37, 0.0 }
  0xe0   :  { %v733_v40 = vmax.f32 %v729_v38, 0.0  ;;  %v693_v41 = vpop.f32.mrf.mxu2 }
  0xe1   :  { %v706_v42 = vpop.f32.mrf.mxu3 }
  0xe2   :  { %v735_v43 = vpack.c.bf16 %v733_v40, %v732_v39 }
  0xe4   :  { %737 = vst [vmem:[%s1710_s3 + $0x8] sm:$0x77] %v735_v43 }

// kernel: cnn_forward.4
= control target key start
LH: loop header
LB: loop body
LE: loop exit
PB: predicated region body
PF: predicated region fallthrough
CT: control target
= control target key end

     0   :  { %vm266_vm0 = vcmask 261120   ;;  %s925_s0 = inlined_call_operand.vmem [shape: bf16[160,512], index: 0, kind: input, shape index: {}]   ;;  %s926_s1 = inlined_call_operand.vmem [shape: bf16[16,160], index: 1, kind: input, shape index: {}]   ;;  %s927_s2 = inlined_call_operand.vmem [shape: f32[16,1], index: 2, kind: input, shape index: {}]   ;;  %s928_s3 = inlined_call_operand.vmem [shape: bf16[16,128], index: 3, kind: output, shape index: {}]  }
   0x1   :  { %v534_v0 = vld [vmem:[%s925_s0 + $0xe0] sm:$0xf]  ;;  %v616_v1 = vld [vmem:[%s925_s0 + $0xec] sm:$0xf0]  ;;  %v614_v5 = vld [vmem:[%s925_s0 + $0xe4] sm:$0xf] }
   0x2   :  { %v566_v2 = vld [vmem:[%s925_s0 + $0x120] sm:$0xf]  ;;  %v535_v3 = vor.u32 %v616_v1, %v534_v0  ;;  %v624_v4 = vld [vmem:[%s925_s0 + $0x12c] sm:$0xf0]  ;;  %v536_v6 = vld [vmem:[%s925_s0 + $0xf0] sm:$0xf0] }
   0x3   :  { %v567_v7 = vor.u32 %v624_v4, %v566_v2  ;;  %v539_v8 = vor.u32 %v614_v5, %v536_v6  ;;  %v574_v9 = vld [vmem:[%s925_s0 + $0x128] sm:$0xf]  ;;  %v625_v10 = vld [vmem:[%s925_s0 + $0x134] sm:$0xf0]  ;;  %v518_v11 = vld [vmem:[%s925_s0 + $0xc0] sm:$0xf] }
   0x4   :  { %270 = vmatpush.bf16.msra.mxu0 %v535_v3  ;;  %v575_v12 = vor.u32 %v625_v10, %v574_v9  ;;  %v612_v13 = vld [vmem:[%s925_s0 + $0xcc] sm:$0xf0]  ;;  %v550_v14 = vld [vmem:[%s925_s0 + $0x100] sm:$0xf]  ;;  %v610_v18 = vld [vmem:[%s925_s0 + $0xc4] sm:$0xf] }
   0x5   :  { %v620_v15 = vld [vmem:[%s925_s0 + $0x10c] sm:$0xf0]  ;;  %290 = vmatpush.bf16.msra.mxu1 %v567_v7  ;;  %298 = vmatpush.bf16.msra.mxu2 %v539_v8  ;;  %v519_v16 = vor.u32 %v612_v13, %v518_v11  ;;  %v520_v19 = vld [vmem:[%s925_s0 + $0xd0] sm:$0xf0]  ;;  %v542_v20 = vld [vmem:[%s925_s0 + $0xe8] sm:$0xf] }
   0x6   :  { %v551_v17 = vor.u32 %v620_v15, %v550_v14  ;;  %346 = vmatpush.bf16.msra.mxu3 %v575_v12  ;;  %v523_v21 = vor.u32 %v610_v18, %v520_v19  ;;  %v617_v22 = vld [vmem:[%s925_s0 + $0xf4] sm:$0xf0]  ;;  %v558_v23 = vld [vmem:[%s925_s0 + $0x108] sm:$0xf]  ;;  %v502_v27 = vld [vmem:[%s925_s0 + $0xa0] sm:$0xf] }
   0x7   :  { %v621_v24 = vld [vmem:[%s925_s0 + $0x114] sm:$0xf0]  ;;  %v543_v25 = vor.u32 %v617_v22, %v542_v20  ;;  %v608_v28 = vld [vmem:[%s925_s0 + $0xac] sm:$0xf0]  ;;  %v606_v29 = vld [vmem:[%s925_s0 + $0xa4] sm:$0xf] }
   0x8   :  { %v559_v26 = vor.u32 %v621_v24, %v558_v23  ;;  %271 = vmatpush.bf16.msra.mxu0 %v519_v16  ;;  %v503_v30 = vor.u32 %v608_v28, %v502_v27  ;;  %v504_v31 = vld [vmem:[%s925_s0 + $0xb0] sm:$0xf0]  ;;  %v615_v32 = vld [vmem:[%s925_s0 + $0xec] sm:$0xf]  ;;  %v544_v33 = vld [vmem:[%s925_s0 + $0xf8] sm:$0xf0] }
   0x9   :  { %291 = vmatpush.bf16.msra.mxu1 %v551_v17  ;;  %299 = vmatpush.bf16.msra.mxu2 %v523_v21  ;;  %v507_v34 = vor.u32 %v606_v29, %v504_v31  ;;  %v547_v35 = vor.u32 %v615_v32, %v544_v33  ;;  %v526_v36 = vld [vmem:[%s925_s0 + $0xc8] sm:$0xf]  ;;  %v613_v37 = vld [vmem:[%s925_s0 + $0xd4] sm:$0xf0]  ;;  %v486_v38 = vld [vmem:[%s925_s0 + $0x80] sm:$0xf] }
   0xa   :  { %347 = vmatpush.bf16.msra.mxu3 %v559_v26  ;;  %v527_v39 = vor.u32 %v613_v37, %v526_v36  ;;  %v604_v40 = vld [vmem:[%s925_s0 + $0x8c] sm:$0xf0]  ;;  %v602_v41 = vld [vmem:[%s925_s0 + $0x84] sm:$0xf]  ;;  %v488_v42 = vld [vmem:[%s925_s0 + $0x90] sm:$0xf0] }
   0xb   :  { %v611_v43 = vld [vmem:[%s925_s0 + $0xcc] sm:$0xf]  ;;  %v528_v44 = vld [vmem:[%s925_s0 + $0xd8] sm:$0xf0]  ;;  %v510_v45 = vld [vmem:[%s925_s0 + $0xa8] sm:$0xf]  ;;  %v487_v46 = vor.u32 %v604_v40, %v486_v38  ;;  %v491_v49 = vor.u32 %v602_v41, %v488_v42 }
   0xc   :  { %272 = vmatpush.bf16.msra.mxu0 %v503_v30  ;;  %v531_v47 = vor.u32 %v611_v43, %v528_v44  ;;  %v609_v48 = vld [vmem:[%s925_s0 + $0xb4] sm:$0xf0]  ;;  %v470_v50 = vld [vmem:[%s925_s0 + $0x60] sm:$0xf]  ;;  %v600_v51 = vld [vmem:[%s925_s0 + $0x6c] sm:$0xf0] }
   0xd   :  { %326 = vmatpush.bf16.msrb.mxu1 %v543_v25  ;;  %300 = vmatpush.bf16.msra.mxu2 %v507_v34  ;;  %v607_v52 = vld [vmem:[%s925_s0 + $0xac] sm:$0xf]  ;;  %v511_v53 = vor.u32 %v609_v48, %v510_v45  ;;  %v598_v54 = vld [vmem:[%s925_s0 + $0x64] sm:$0xf]  ;;  %v472_v55 = vld [vmem:[%s925_s0 + $0x70] sm:$0xf0]  ;;  %v471_v61 = vor.u32 %v600_v51, %v470_v50 }
   0xe   :  { %354 = vmatpush.bf16.msrb.mxu3 %v547_v35  ;;  %v512_v56 = vld [vmem:[%s925_s0 + $0xb8] sm:$0xf0]  ;;  %v494_v58 = vld [vmem:[%s925_s0 + $0x88] sm:$0xf]  ;;  %v605_v59 = vld [vmem:[%s925_s0 + $0x94] sm:$0xf0]  ;;  %v475_v0 = vor.u32 %v598_v54, %v472_v55 }
   0xf   :  { %v515_v57 = vor.u32 %v607_v52, %v512_v56  ;;  %v584_v60 = vld [vmem:[%s926_s1 + $0x4] sm:$0xf]  ;;  %v454_v62 = vld [vmem:[%s925_s0 + $0x40] sm:$0xf]  ;;  %v416_v63 = vld [vmem:[%s926_s1 + $0x8] sm:$0xf0]  ;;  %v495_v5 = vor.u32 %v605_v59, %v494_v58 }
  0x10   :  { %273 = vmatpush.bf16.msra.mxu0 %v487_v46  ;;  %v596_v1 = vld [vmem:[%s925_s0 + $0x4c] sm:$0xf0]  ;;  %v792_v2 = vor.u32 %v584_v60, %v416_v63  ;;  %v603_v3 = vld [vmem:[%s925_s0 + $0x8c] sm:$0xf]  ;;  %v496_v4 = vld [vmem:[%s925_s0 + $0x98] sm:$0xf0] }
  0x11   :  { %327 = vmatpush.bf16.msrb.mxu1 %v527_v39  ;;  %301 = vmatpush.bf16.msra.mxu2 %v491_v49  ;;  %v594_v6 = vld [vmem:[%s925_s0 + $0x44] sm:$0xf]  ;;  %v456_v7 = vld [vmem:[%s925_s0 + $0x50] sm:$0xf0]  ;;  %v499_v8 = vor.u32 %v603_v3, %v496_v4  ;;  %v478_v9 = vld [vmem:[%s925_s0 + $0x68] sm:$0xf]  ;;  %v455_v11 = vor.u32 %v596_v1, %v454_v62 }
  0x12   :  { %355 = vmatpush.bf16.msrb.mxu3 %v531_v47  ;;  %580 = vmatmul.msk.bf16.vlgmr.msra.gmra.mxu1 %vm266_vm0, %v792_v2  ;;  %v601_v10 = vld [vmem:[%s925_s0 + $0x74] sm:$0xf0]  ;;  %v599_v12 = vld [vmem:[%s925_s0 + $0x6c] sm:$0xf]  ;;  %v480_v13 = vld [vmem:[%s925_s0 + $0x78] sm:$0xf0]  ;;  %v459_v14 = vor.u32 %v594_v6, %v456_v7 }
  0x13   :  { %582 = vmatmul.msk.bf16.vlgmr.msra.gmra.mxu3 %vm266_vm0, %v792_v2  ;;  %v438_v15 = vld [vmem:[%s925_s0 + $0x20] sm:$0xf]  ;;  %v592_v16 = vld [vmem:[%s925_s0 + $0x2c] sm:$0xf0]  ;;  %v479_v17 = vor.u32 %v601_v10, %v478_v9  ;;  %v590_v18 = vld [vmem:[%s925_s0 + $0x24] sm:$0xf]  ;;  %v483_v20 = vor.u32 %v599_v12, %v480_v13 }
  0x14   :  { %274 = vmatpush.bf16.msra.mxu0 %v471_v61  ;;  %v440_v19 = vld [vmem:[%s925_s0 + $0x30] sm:$0xf0]  ;;  %v462_v21 = vld [vmem:[%s925_s0 + $0x48] sm:$0xf]  ;;  %v597_v22 = vld [vmem:[%s925_s0 + $0x54] sm:$0xf0]  ;;  %v439_v24 = vor.u32 %v592_v16, %v438_v15 }
  0x15   :  { %328 = vmatpush.bf16.msrb.mxu1 %v511_v53  ;;  %302 = vmatpush.bf16.msra.mxu2 %v475_v0  ;;  %v422_v23 = vld [vmem:[%s925_s0] sm:$0xf]  ;;  %v588_v25 = vld [vmem:[%s925_s0 + $0xc] sm:$0xf0]  ;;  %v595_v26 = vld [vmem:[%s925_s0 + $0x4c] sm:$0xf]  ;;  %v443_v28 = vor.u32 %v590_v18, %v440_v19  ;;  %v463_v32 = vor.u32 %v597_v22, %v462_v21 }
  0x16   :  { %356 = vmatpush.bf16.msrb.mxu3 %v515_v57  ;;  %v464_v27 = vld [vmem:[%s925_s0 + $0x58] sm:$0xf0]  ;;  %v586_v29 = vld [vmem:[%s925_s0 + $0x4] sm:$0xf]  ;;  %v424_v30 = vld [vmem:[%s925_s0 + $0x10] sm:$0xf0]  ;;  %v423_v40 = vor.u32 %v588_v25, %v422_v23 }
  0x17   :  { %v446_v31 = vld [vmem:[%s925_s0 + $0x28] sm:$0xf]  ;;  %v593_v33 = vld [vmem:[%s925_s0 + $0x34] sm:$0xf0]  ;;  %v414_v34 = vld [vmem:[%s926_s1] sm:$0xf]  ;;  %v467_v36 = vor.u32 %v595_v26, %v464_v27  ;;  %v427_v44 = vor.u32 %v586_v29, %v424_v30 }
  0x18   :  { %275 = vmatpush.bf16.msra.mxu0 %v455_v11  ;;  %v622_v35 = vld [vmem:[%s925_s0 + $0x124] sm:$0xf]  ;;  %v568_v37 = vld [vmem:[%s925_s0 + $0x130] sm:$0xf0]  ;;  %v623_v38 = vld [vmem:[%s925_s0 + $0x12c] sm:$0xf]  ;;  %v447_v47 = vor.u32 %v593_v33, %v446_v31 }
  0x19   :  { %329 = vmatpush.bf16.msrb.mxu1 %v495_v5  ;;  %303 = vmatpush.bf16.msra.mxu2 %v459_v14  ;;  %v576_v39 = vld [vmem:[%s925_s0 + $0x138] sm:$0xf0]  ;;  %v585_v41 = vld [vmem:[%s926_s1 + $0x4] sm:$0xf0]  ;;  %v591_v42 = vld [vmem:[%s925_s0 + $0x2c] sm:$0xf]  ;;  %v571_v48 = vor.u32 %v622_v35, %v568_v37 }
  0x1a   :  { %357 = vmatpush.bf16.msrb.mxu3 %v499_v8  ;;  %v448_v43 = vld [vmem:[%s925_s0 + $0x38] sm:$0xf0]  ;;  %v579_v45 = vor.u32 %v623_v38, %v576_v39  ;;  %v388_v46 = vld [vmem:[%s927_s2] sm:$0xff]  ;;  %v430_v49 = vld [vmem:[%s925_s0 + $0x8] sm:$0xf]  ;;  %v633_v52 = vmov 0   ;;  %v415_v53 = vor.u32 %v585_v41, %v414_v34 }
  0x1b   :  { %v619_v50 = vld [vmem:[%s925_s0 + $0x10c] sm:$0xf]  ;;  %v560_v51 = vld [vmem:[%s925_s0 + $0x118] sm:$0xf0]  ;;  %632 = vset.pattern.permute.xlu0 %v633_v52  ;;  %v451_v54 = vor.u32 %v591_v42, %v448_v43  ;;  %v589_v55 = vld [vmem:[%s925_s0 + $0x14] sm:$0xf0] }
  0x1c   :  { %276 = vmatpush.bf16.msra.mxu0 %v439_v24  ;;  %v618_v56 = vld [vmem:[%s925_s0 + $0x104] sm:$0xf]  ;;  %v552_v57 = vld [vmem:[%s925_s0 + $0x110] sm:$0xf0]  ;;  %392 = vperm.xlu0 %632, %v388_v46   ;;  %v587_v58 = vld [vmem:[%s925_s0 + $0xc] sm:$0xf]  ;;  %v563_v60 = vor.u32 %v619_v50, %v560_v51  ;;  %v431_v61 = vor.u32 %v589_v55, %v430_v49 }
  0x1d   :  { %330 = vmatpush.bf16.msrb.mxu1 %v479_v17  ;;  %304 = vmatpush.bf16.msra.mxu2 %v443_v28  ;;  %v432_v59 = vld [vmem:[%s925_s0 + $0x18] sm:$0xf0]  ;;  %v555_v62 = vor.u32 %v618_v56, %v552_v57  ;;  %v389_v0 = vld [vmem:[%s927_s2 + $0x8] sm:$0xff] }
  0x1e   :  { %358 = vmatpush.bf16.msrb.mxu3 %v483_v20  ;;  %v435_v63 = vor.u32 %v587_v58, %v432_v59 }
  0x20   :  { %277 = vmatpush.bf16.msra.mxu0 %v423_v40 }
  0x21   :  { %331 = vmatpush.bf16.msrb.mxu1 %v463_v32  ;;  %305 = vmatpush.bf16.msra.mxu2 %v427_v44 }
  0x22   :  { %359 = vmatpush.bf16.msrb.mxu3 %v467_v36 }
  0x23   :  { %278 = vmatmul.bf16.vlgmr.msra.gmra.mxu0 %v415_v53 }
  0x24   :  { %374 = vmatpush.bf16.msrb.mxu0 %v579_v45  ;;  %306 = vmatmul.bf16.vlgmr.msra.gmra.mxu2 %v415_v53 }
  0x25   :  { %332 = vmatpush.bf16.msrb.mxu1 %v447_v47  ;;  %318 = vmatpush.bf16.msrb.mxu2 %v571_v48 }
  0x26   :  { %360 = vmatpush.bf16.msrb.mxu3 %v451_v54  ;;  %397 = vperm.xlu0 %632, %v389_v0  }
  0x28   :  { %375 = vmatpush.bf16.msrb.mxu0 %v563_v60 }
  0x29   :  { %333 = vmatpush.bf16.msrb.mxu1 %v431_v61  ;;  %319 = vmatpush.bf16.msrb.mxu2 %v555_v62 }
  0x2a   :  { %361 = vmatpush.bf16.msrb.mxu3 %v435_v63 }
  0x2c   :  { %334 = vmatmul.bf16.vlgmr.msrb.gmra.mxu1 %v415_v53 }
  0x2d   :  { %362 = vmatmul.bf16.vlgmr.msrb.gmra.mxu3 %v415_v53 }
  0x33   :  { %583 = vmatmul.msk.bf16.vlgmr.msrb.gmra.mxu0 %vm266_vm0, %v792_v2 }
  0x34   :  { %581 = vmatmul.msk.bf16.vlgmr.msrb.gmra.mxu2 %vm266_vm0, %v792_v2 }
  0x8e   :  { %v393_v17 = vpop.permute.xlu0 %392 }
  0x8f   :  { %v293_v1 = vpop.f32.mrf.mxu1 }
  0x96   :  { %v349_v3 = vpop.f32.mrf.mxu3 }
  0x97   :  { %v295_v7 = vpop.f32.mrf.mxu1 }
  0x98   :  { %v398_v33 = vpop.permute.xlu0 %397 }
  0x9e   :  { %v351_v8 = vpop.f32.mrf.mxu3 }
  0xa0   :  { %v279_v4 = vpop.f32.mrf.mxu0 }
  0xa1   :  { %v294_v15 = vadd.f32 %v293_v1, %v279_v4 }
  0xa7   :  { %v307_v5 = vpop.f32.mrf.mxu2 }
  0xa8   :  { %v281_v6 = vpop.f32.mrf.mxu0 }
  0xa9   :  { %v335_v11 = vpop.f32.mrf.mxu1  ;;  %v296_v25 = vadd.f32 %v295_v7, %v281_v6 }
  0xaa   :  { %v350_v19 = vadd.f32 %v349_v3, %v335_v11 }
  0xaf   :  { %v309_v9 = vpop.f32.mrf.mxu2 }
  0xb0   :  { %v377_v10 = vpop.f32.mrf.mxu0  ;;  %v363_v12 = vpop.f32.mrf.mxu3 }
  0xb1   :  { %v378_v16 = vadd.f32 %v377_v10, %v363_v12  ;;  %v337_v2 = vpop.f32.mrf.mxu1 }
  0xb2   :  { %v352_v26 = vadd.f32 %v351_v8, %v337_v2 }
  0xb3   :  { %v384_v22 = vmax.f32 %v350_v19, %v378_v16 }
  0xb7   :  { %v321_v13 = vpop.f32.mrf.mxu2 }
  0xb8   :  { %v322_v14 = vadd.f32 %v321_v13, %v307_v5  ;;  %v379_v18 = vpop.f32.mrf.mxu0  ;;  %v365_v21 = vpop.f32.mrf.mxu3 }
  0xb9   :  { %v380_v23 = vadd.f32 %v379_v18, %v365_v21 }
  0xba   :  { %v382_v20 = vmax.f32 %v294_v15, %v322_v14 }
  0xbb   :  { %v385_v29 = vmax.f32 %v352_v26, %v380_v23 }
  0xbc   :  { %v386_v27 = vmax.f32 %v382_v20, %v384_v22 }
  0xbe   :  { %v400_v31 = vadd.f32 %v393_v17, %v386_v27 }
  0xbf   :  { %v323_v24 = vpop.f32.mrf.mxu2 }
  0xc0   :  { %v324_v28 = vadd.f32 %v323_v24, %v309_v9  ;;  %v402_v35 = vmax.f32 %v400_v31, 0.0 }
  0xc2   :  { %v383_v30 = vmax.f32 %v296_v25, %v324_v28 }
  0xc4   :  { %v387_v32 = vmax.f32 %v383_v30, %v385_v29 }
  0xc6   :  { %v401_v34 = vadd.f32 %v398_v33, %v387_v32 }
  0xc8   :  { %v403_v36 = vmax.f32 %v401_v34, 0.0 }
  0xca   :  { %v629_v37 = vpack.c.bf16 %v403_v36, %v402_v35 }
  0xcc   :  { %630 = vst [vmem:[%s928_s3] sm:$0xff] %v629_v37  }

// kernel: cnn_forward.5
= control target key start
LH: loop header
LB: loop body
LE: loop exit
PB: predicated region body
PF: predicated region fallthrough
CT: control target
= control target key end

     0   :  { %s896_s0 = inlined_call_operand.vmem [shape: bf16[2,400], index: 0, kind: input, shape index: {}]   ;;  %s897_s1 = inlined_call_operand.vmem [shape: bf16[400,128], index: 1, kind: input, shape index: {}]   ;;  %s898_s2 = inlined_call_operand.vmem [shape: f32[1,128], index: 2, kind: input, shape index: {}]   ;;  %s899_s3 = inlined_call_operand.vmem [shape: bf16[128,128], index: 3, kind: input, shape index: {}]   ;;  %s900_s4 = inlined_call_operand.vmem [shape: f32[1,128], index: 4, kind: input, shape index: {}]   ;;  %s901_s5 = inlined_call_operand.vmem [shape: bf16[128,10], index: 5, kind: input, shape index: {}]   ;;  %s902_s6 = inlined_call_operand.vmem [shape: f32[1,10], index: 6, kind: input, shape index: {}]   ;;  %s903_s7 = inlined_call_operand.hbm [shape: f32[2,10], index: 7, kind: output, shape index: {}]  }
   0x1   :  { %v653_v0 = vld [vmem:[%s897_s1 + $0x38] sm:$0xff]  ;;  %v652_v3 = vld [vmem:[%s897_s1 + $0x30] sm:$0xff]  ;;  %v651_v6 = vld [vmem:[%s897_s1 + $0x28] sm:$0xff] }
   0x2   :  { %v661_v1 = vld [vmem:[%s897_s1 + $0x78] sm:$0xff]  ;;  %245 = vmatpush.bf16.msra.mxu0 %v653_v0  ;;  %v660_v4 = vld [vmem:[%s897_s1 + $0x70] sm:$0xff]  ;;  %v659_v7 = vld [vmem:[%s897_s1 + $0x68] sm:$0xff] }
   0x3   :  { %v669_v2 = vld [vmem:[%s897_s1 + $0xb8] sm:$0xff]  ;;  %258 = vmatpush.bf16.msra.mxu1 %v661_v1  ;;  %v668_v5 = vld [vmem:[%s897_s1 + $0xb0] sm:$0xff]  ;;  %v670_v8 = vld [vmem:[%s897_s1 + $0xc0] sm:$0xff] }
   0x4   :  { %271 = vmatpush.bf16.msra.mxu2 %v669_v2  ;;  %v667_v9 = vld [vmem:[%s897_s1 + $0xa8] sm:$0xff]  ;;  %v28_v10 = vld [vmem:[%s896_s0] sm:$0xf]  ;;  %291 = vmatpush.bf16.msra.mxu3 %v670_v8  ;;  %v678_v11 = vld [vmem:[%s899_s3 + $0x38] sm:$0xff] }
   0x5   :  { %84 = vst [vmem:[#allocation1] ss:$9 sm:$0xff] %v28_v10  ;;  %v650_v12 = vld [vmem:[%s897_s1 + $0x20] sm:$0xff]  ;;  %v677_v15 = vld [vmem:[%s899_s3 + $0x30] sm:$0xff] }
   0x6   :  { %246 = vmatpush.bf16.msra.mxu0 %v652_v3  ;;  %v658_v13 = vld [vmem:[%s897_s1 + $0x60] sm:$0xff] }
   0x7   :  { %259 = vmatpush.bf16.msra.mxu1 %v660_v4  ;;  %v666_v14 = vld [vmem:[%s897_s1 + $0xa0] sm:$0xff] }
   0x8   :  { %272 = vmatpush.bf16.msra.mxu2 %v668_v5  ;;  %367 = vmatpush.bf16.msrb.mxu3 %v678_v11 }
   0xa   :  { %247 = vmatpush.bf16.msra.mxu0 %v651_v6 }
   0xb   :  { %260 = vmatpush.bf16.msra.mxu1 %v659_v7 }
   0xc   :  { %273 = vmatpush.bf16.msra.mxu2 %v667_v9 }
   0xd   :  { %12 = vsyncpa [#allocation3], 0  ;;  %vm242_vm0 = vcmask 130048   ;;  %v649_v16 = vld [vmem:[%s897_s1 + $0x18] sm:$0xff]  ;;  %368 = vmatpush.bf16.msrb.mxu3 %v677_v15  ;;  %v676_v20 = vld [vmem:[%s899_s3 + $0x28] sm:$0xff]  ;;  %s717_s16 = smov [#allocation2]  }
   0xe   :  { %248 = vmatpush.bf16.msra.mxu0 %v650_v12  ;;  %v657_v17 = vld [vmem:[%s897_s1 + $0x58] sm:$0xff]  ;;  %v648_v21 = vld [vmem:[%s897_s1 + $0x10] sm:$0xff]  ;;  %v675_v24 = vld [vmem:[%s899_s3 + $0x20] sm:$0xff]  ;;  %vm463_vm1 = vcmask 74752  }
   0xf   :  { %261 = vmatpush.bf16.msra.mxu1 %v658_v13  ;;  %v665_v18 = vld [vmem:[%s897_s1 + $0x98] sm:$0xff]  ;;  %v656_v22 = vld [vmem:[%s897_s1 + $0x50] sm:$0xff]  ;;  %v647_v25 = vld [vmem:[%s897_s1 + $0x8] sm:$0xff] }
  0x10   :  { %274 = vmatpush.bf16.msra.mxu2 %v666_v14  ;;  %v88_v19 = vld [vmem:[#allocation1 + $0x1b] sm:$0xff]  ;;  %v664_v23 = vld [vmem:[%s897_s1 + $0x90] sm:$0xff]  ;;  %v655_v26 = vld [vmem:[%s897_s1 + $0x48] sm:$0xff] }
  0x11   :  { %581 = vmatmul.msk.bf16.vlgmr.msra.gmra.mxu3 %vm242_vm0, %v88_v19  ;;  %v663_v27 = vld [vmem:[%s897_s1 + $0x88] sm:$0xff]  ;;  %v646_v28 = vld [vmem:[%s897_s1] sm:$0xff]  ;;  %v87_v33 = vld [vmem:[#allocation1 + $0x12] sm:$0xff] }
  0x12   :  { %249 = vmatpush.bf16.msra.mxu0 %v649_v16  ;;  %369 = vmatpush.bf16.msrb.mxu3 %v676_v20  ;;  %v654_v29 = vld [vmem:[%s897_s1 + $0x40] sm:$0xff]  ;;  %v86_v32 = vld [vmem:[#allocation1 + $0x9] sm:$0xff]  ;;  %v674_v34 = vld [vmem:[%s899_s3 + $0x18] sm:$0xff] }
  0x13   :  { %262 = vmatpush.bf16.msra.mxu1 %v657_v17  ;;  %v662_v30 = vld [vmem:[%s897_s1 + $0x80] sm:$0xff]  ;;  %v673_v35 = vld [vmem:[%s899_s3 + $0x10] sm:$0xff]  ;;  %v672_v36 = vld [vmem:[%s899_s3 + $0x8] sm:$0xff]  ;;  %s470_s1 = sshll.u32 %s717_s16, 4  ;;  %s471_s1 = int_to_ptr.vmem [resolvable:$true] %s470_s1 }
  0x14   :  { %275 = vmatpush.bf16.msra.mxu2 %v665_v18  ;;  %v85_v31 = vld [vmem:[#allocation1] sm:$0xff]  ;;  %v686_v38 = vld [vmem:[%s901_s5 + $0x38] sm:$0xff]  ;;  %v685_v39 = vld [vmem:[%s901_s5 + $0x30] sm:$0xff] }
  0x15   :  { %v671_v37 = vld [vmem:[%s899_s3] sm:$0xff]  ;;  %v684_v41 = vld [vmem:[%s901_s5 + $0x28] sm:$0xff]  ;;  %v682_v45 = vld [vmem:[%s901_s5 + $0x18] sm:$0xff] }
  0x16   :  { %250 = vmatpush.bf16.msra.mxu0 %v648_v21  ;;  %370 = vmatpush.bf16.msrb.mxu3 %v675_v24  ;;  %v683_v42 = vld [vmem:[%s901_s5 + $0x20] sm:$0xff]  ;;  %v681_v49 = vld [vmem:[%s901_s5 + $0x10] sm:$0xff]  ;;  %v680_v59 = vld [vmem:[%s901_s5 + $0x8] sm:$0xff] }
  0x17   :  { %263 = vmatpush.bf16.msra.mxu1 %v656_v22  ;;  %v688_v43 = vld [vmem:[%s898_s2] ss:$0 sm:$0xff] }
  0x18   :  { %276 = vmatpush.bf16.msra.mxu2 %v664_v23  ;;  %v679_v60 = vld [vmem:[%s901_s5] sm:$0xff]  ;;  %s472_s5 = sshll.u32 %s903_s7, 4  ;;  %s473_s5 = int_to_ptr.hbm [resolvable:$true] %s472_s5 }
  0x19   :  { %v689_v61 = vld [vmem:[%s900_s4] ss:$0 sm:$0xff] }
  0x1a   :  { %251 = vmatpush.bf16.msra.mxu0 %v647_v25  ;;  %371 = vmatpush.bf16.msrb.mxu3 %v674_v34  ;;  %v690_v3 = vld [vmem:[%s902_s6] ss:$0 sm:$0xff] }
  0x1b   :  { %264 = vmatpush.bf16.msra.mxu1 %v655_v26 }
  0x1c   :  { %277 = vmatpush.bf16.msra.mxu2 %v663_v27 }
  0x1e   :  { %252 = vmatpush.bf16.msra.mxu0 %v646_v28  ;;  %372 = vmatpush.bf16.msrb.mxu3 %v673_v35 }
  0x1f   :  { %265 = vmatpush.bf16.msra.mxu1 %v654_v29 }
  0x20   :  { %278 = vmatpush.bf16.msra.mxu2 %v662_v30 }
  0x21   :  { %253 = vmatmul.bf16.vlgmr.msra.gmra.mxu0 %v85_v31 }
  0x22   :  { %266 = vmatmul.bf16.vlgmr.msra.gmra.mxu1 %v86_v32  ;;  %373 = vmatpush.bf16.msrb.mxu3 %v672_v36 }
  0x23   :  { %279 = vmatmul.bf16.vlgmr.msra.gmra.mxu2 %v87_v33  ;;  %450 = vmatpush.bf16.msrb.mxu0 %v686_v38 }
  0x26   :  { %374 = vmatpush.bf16.msrb.mxu3 %v671_v37 }
  0x27   :  { %451 = vmatpush.bf16.msrb.mxu0 %v685_v39 }
  0x2b   :  { %452 = vmatpush.bf16.msrb.mxu0 %v684_v41 }
  0x2f   :  { %453 = vmatpush.bf16.msrb.mxu0 %v683_v42 }
  0x33   :  { %454 = vmatpush.bf16.msrb.mxu0 %v682_v45 }
  0x37   :  { %455 = vmatpush.bf16.msrb.mxu0 %v681_v49 }
  0x3b   :  { %456 = vmatpush.bf16.msrb.mxu0 %v680_v59 }
  0x3f   :  { %457 = vmatpush.bf16.msrb.mxu0 %v679_v60 }
  0x94   :  { %v293_v40 = vpop.f32.mrf.mxu3 }
  0x9c   :  { %v295_v44 = vpop.f32.mrf.mxu3 }
  0x9e   :  { %v254_v46 = vpop.f32.mrf.mxu0 }
  0x9f   :  { %v267_v47 = vpop.f32.mrf.mxu1  ;;  %v255_v48 = vadd.f32 %v688_v43, %v254_v46 }
  0xa1   :  { %v268_v50 = vadd.f32 %v267_v47, %v255_v48 }
  0xa6   :  { %v280_v51 = vpop.f32.mrf.mxu2  ;;  %v256_v53 = vpop.f32.mrf.mxu0 }
  0xa7   :  { %v281_v52 = vadd.f32 %v280_v51, %v268_v50  ;;  %v269_v54 = vpop.f32.mrf.mxu1 }
  0xa9   :  { %v294_v55 = vadd.f32 %v293_v40, %v281_v52 }
  0xab   :  { %v297_v56 = vmax.f32 %v294_v55, 0.0 }
  0xad   :  { %v298_v57 = vpack.c.bf16 %v297_v56, %v297_v56 }
  0xae   :  { %v282_v58 = vpop.f32.mrf.mxu2 }
  0xaf   :  { %375 = vmatmul.bf16.vlgmr.msrb.gmra.mxu3 %v298_v57 }
 0x132   :  { %v376_v62 = vpop.f32.mrf.mxu3 }
 0x133   :  { %v377_v63 = vadd.f32 %v689_v61, %v376_v62 }
 0x135   :  { %v380_v0 = vmax.f32 %v377_v63, 0.0 }
 0x137   :  { %v381_v1 = vpack.c.bf16 %v380_v0, %v380_v0 }
 0x139   :  { %458 = vmatmul.bf16.vlgmr.msrb.gmra.mxu0 %v381_v1 }
 0x13a   :  { %v378_v2 = vpop.f32.mrf.mxu3 }
 0x1b6   :  { %v459_v4 = vpop.f32.mrf.mxu0 }
 0x1b7   :  { %v460_v5 = vadd.f32 %v690_v3, %v459_v4 }
 0x1b9   :  { %464 = vst.msk [vmem:[#allocation2] sm:$0x3] %vm463_vm1, %v460_v5 }
 0x1ba   :  { %475 = dma.vmem_to_hbm [thread:$0]  %s471_s1, 32, %s473_s5, [#allocation3]  }
 0x1be   :  { %v461_v6 = vpop.f32.mrf.mxu0 }
 0x1bf   :  { %715 = dma.done.wait [#allocation3], 32  }
 0x1c0   :  { %716 = vsyncadd [#allocation3], 4294967264 }
 0x1c1   :  { %480 = vsyncpa [#allocation3], 1 }

</bundles_post_ra>
